<compile_context>
chip_gen: v7x
topology: tpu7x:2x2x1
jax: 0.10.0
libtpu: 0.0.40
codegen_flags: <defaults>
</compile_context>

<pallas_src>
import math
import functools

import jax
import jax.numpy as jnp
from jax.experimental import pallas as pl
from jax.experimental.pallas import tpu as pltpu

BN_EPS = 1e-3


def _vmem_limit_bytes():
    """Per-generation scoped-VMEM budget with headroom (v7x: 64 MiB physical)."""
    cap = None
    try:
        info_fn = getattr(pltpu, "get_tpu_info", None)
        if info_fn is not None:
            cap = getattr(info_fn(), "vmem_capacity_bytes", None)
    except Exception:
        cap = None
    if not cap:
        return 48 * 1024 * 1024
    return int(max(32 * 1024 * 1024, min(cap - 16 * 1024 * 1024, 112 * 1024 * 1024)))


def _sigmoid(x):
    # Numerically stable sigmoid via tanh (EUP slot); no exp(-x) overflow.
    return 0.5 * jnp.tanh(0.5 * x) + 0.5


def _silu(x):
    return x * _sigmoid(x)


def _bn_fold(c):
    gamma = jnp.ones((c,), jnp.float32)
    beta = jnp.zeros((c,), jnp.float32)
    mean = jnp.zeros((c,), jnp.float32)
    var = jnp.ones((c,), jnp.float32)
    scale = gamma * jax.lax.rsqrt(var + BN_EPS)
    bias = beta - mean * scale
    return scale, bias


# ----------------------------------------------------------------------------
# Kernel 1: row-tiled depthwise conv + BN + SiLU + SE squeeze/excitation
# ----------------------------------------------------------------------------

def _dw_se_kernel(tile_ref, w_ref, sc_ref, bi_ref, w1_ref, b1_ref, w2_ref, b2_ref,
                  y_ref, g_ref, se_acc_ref, *, k, stride, th, wo, inv_hw):
    """Per (image, row-tile) grid step.
       tile_ref : (1, s*s*(th+q), wph, C) bf16  phase rows for this tile (+halo)
       w_ref    : (k*k, C) f32 depthwise taps;  sc/bi: (1, C) folded BN
       w1/b1/w2/b2 : SE excitation MLP
       y_ref    : (1, C, th*wo) bf16 depthwise activation (channel-major, lane-dense)
       g_ref    : (1, 1, C) f32 SE gate (written on the last row tile)
       se_acc_ref : (1, C) f32 VMEM scratch, running per-channel sum for SE squeeze."""
    t = pl.program_id(1)
    c = y_ref.shape[1]
    q = (k - 1) // stride
    slab = th + q

    @pl.when(t == 0)
    def _():
        se_acc_ref[...] = jnp.zeros_like(se_acc_ref)

    w = w_ref[...]                                           # (k*k, C)

    # Tap accumulation directly at the strided output resolution (static slices).
    acc = jnp.zeros((th, wo, c), jnp.float32)
    for dy in range(k):
        qy, ry = divmod(dy, stride)
        for dx in range(k):
            qx, rx = divmod(dx, stride)
            row0 = (ry * stride + rx) * slab + qy            # static offset
            tap = tile_ref[0, row0:row0 + th, qx:qx + wo, :].astype(jnp.float32)
            acc = acc + tap * w[dy * k + dx]

    y = acc * sc_ref[...] + bi_ref[...]                      # folded BN
    y = _silu(y)                                             # SiLU

    y2 = y.reshape(th * wo, c)                               # (HWtile, C) f32
    se_acc_ref[...] += jnp.sum(y2, axis=0, keepdims=True)    # SE squeeze (f32 sum)
    # Channel-major, lane-dense bf16 store (HW tile on the 128-lane axis).
    y_ref[0] = jnp.transpose(y2).astype(y_ref.dtype)         # (C, th*wo)

    @pl.when(t == pl.num_programs(1) - 1)
    def _():
        pooled = se_acc_ref[...] * inv_hw                    # (1, C) exact mean
        h = jnp.dot(pooled, w1_ref[...],
                    preferred_element_type=jnp.float32) + b1_ref[...]
        h = _silu(h)
        g = jnp.dot(h, w2_ref[...],
                    preferred_element_type=jnp.float32) + b2_ref[...]
        g_ref[...] = _sigmoid(g)[None]                       # (1, 1, C) f32


# ----------------------------------------------------------------------------
# Kernel 2: SE-gated 1x1 pointwise conv + folded BN, channel-major output
# ----------------------------------------------------------------------------

def _pw_gate_kernel(y_ref, g_ref, wt_ref, sc_ref, bi_ref, o_ref):
    """y_ref:(1,C,TM) bf16, g_ref:(1,1,C) f32 gate, wt_ref:(Cout,C) f32,
       sc/bi:(Cout,1) f32 folded BN, o_ref:(1,Cout,TM) f32."""
    # Fold the per-channel SE gate into the small weight matrix (Cout x C)
    # instead of rescaling the whole activation tile.
    wg = (wt_ref[...] * g_ref[0]).astype(jnp.bfloat16)       # (Cout, C)
    acc = jnp.dot(wg, y_ref[0], preferred_element_type=jnp.float32)  # (Cout, TM)
    o_ref[0] = acc * sc_ref[...] + bi_ref[...]               # folded BN, lane-dense


# ----------------------------------------------------------------------------
# XLA glue: phase (space-to-depth) + per-row-tile halo slab construction
# ----------------------------------------------------------------------------

def _pick_row_tile(ho, wo, c, k, stride):
    """Largest th | ho with lane-dense (th*wo % 128 == 0) stores (or th == ho)
       whose working set stays comfortably inside VMEM."""
    q = (k - 1) // stride
    wph = wo + q
    budget = 6 * 1024 * 1024

    def tile_bytes(th):
        return (2 * stride * stride * (th + q) * wph * c * 2   # dbl-buffered bf16 in
                + 2 * th * wo * c * 2                          # dbl-buffered bf16 out
                + 2 * th * wo * c * 4)                         # f32 working set

    cands = [th for th in range(1, ho + 1)
             if ho % th == 0 and (th == ho or (th * wo) % 128 == 0)]
    fitting = [th for th in cands if tile_bytes(th) <= budget]
    return max(fitting) if fitting else min(cands)


def _prepare_tiles(x, k, stride, th):
    """x:(N,H,W,C) f32 -> tiles (N*n_tiles, s*s*(th+q), wph, C) bf16, where
       tiles[b*T+t, p*(th+q)+a, bcol] == xpad[s*(t*th+a)+ry, s*bcol+rx] for
       phase p = ry*s+rx (halo rows duplicated per tile -> plain Blocked specs)."""
    n, h, w, c = x.shape
    s = stride
    p = (k - 1) // 2
    ho = (h + 2 * p - k) // s + 1
    wo = (w + 2 * p - k) // s + 1
    q = (k - 1) // s
    hph, wph = ho + q, wo + q
    pad_b = max(p, s * hph - h - p)
    pad_r = max(p, s * wph - w - p)
    xp = jnp.pad(x, ((0, 0), (p, pad_b), (p, pad_r), (0, 0)))
    phases = jnp.stack([xp[:, ry::s, rx::s, :][:, :hph, :wph, :]
                        for ry in range(s) for rx in range(s)], axis=1)
    n_tiles = ho // th
    slabs = jnp.stack([phases[:, :, t * th:t * th + th + q]
                       for t in range(n_tiles)], axis=1)       # (N,T,s*s,th+q,wph,C)
    tiles = slabs.reshape(n * n_tiles, s * s * (th + q), wph, c).astype(jnp.bfloat16)
    return tiles, ho, wo, wph, n_tiles


# ----------------------------------------------------------------------------
# Forward pass
# ----------------------------------------------------------------------------

@functools.partial(jax.jit, static_argnames=("k", "stride", "row_tile"))
def dep_se_sep_forward(params, x_nchw, *, k, stride, row_tile=None):
    x = jnp.transpose(x_nchw, (0, 2, 3, 1)).astype(jnp.float32)   # NCHW -> NHWC
    n, h, w, c = x.shape
    cs = params["se_w1"].shape[1]
    cout = params["pw_w"].shape[1]
    p = (k - 1) // 2
    ho = (h + 2 * p - k) // stride + 1
    wo = (w + 2 * p - k) // stride + 1
    q = (k - 1) // stride

    th = row_tile if row_tile is not None else _pick_row_tile(ho, wo, c, k, stride)
    assert ho % th == 0 and (th == ho or (th * wo) % 128 == 0), (th, ho, wo)

    tiles, ho, wo, wph, n_tiles = _prepare_tiles(x, k, stride, th)
    hw = ho * wo
    ph_rows = stride * stride * (th + q)
    vmem = _vmem_limit_bytes()

    # ---- Kernel 1: row-tiled depthwise + BN + SiLU + SE squeeze/excitation ----
    y, gate = pl.pallas_call(
        functools.partial(_dw_se_kernel, k=k, stride=stride, th=th, wo=wo,
                          inv_hw=1.0 / float(hw)),
        grid=(n, n_tiles),
        in_specs=[
            pl.BlockSpec((1, ph_rows, wph, c),
                         lambda b, t: (b * n_tiles + t, 0, 0, 0)),
            pl.BlockSpec((k * k, c), lambda b, t: (0, 0)),
            pl.BlockSpec((1, c), lambda b, t: (0, 0)),
            pl.BlockSpec((1, c), lambda b, t: (0, 0)),
            pl.BlockSpec((c, cs), lambda b, t: (0, 0)),
            pl.BlockSpec((1, cs), lambda b, t: (0, 0)),
            pl.BlockSpec((cs, c), lambda b, t: (0, 0)),
            pl.BlockSpec((1, c), lambda b, t: (0, 0)),
        ],
        out_specs=(
            pl.BlockSpec((1, c, th * wo), lambda b, t: (b, 0, t)),
            pl.BlockSpec((1, 1, c), lambda b, t: (b, 0, 0)),
        ),
        out_shape=(
            jax.ShapeDtypeStruct((n, c, hw), jnp.bfloat16),
            jax.ShapeDtypeStruct((n, 1, c), jnp.float32),
        ),
        scratch_shapes=[pltpu.VMEM((1, c), jnp.float32)],
        compiler_params=pltpu.CompilerParams(
            dimension_semantics=("parallel", "arbitrary"),
            vmem_limit_bytes=vmem),
    )(tiles,
      params["dw_w"].reshape(k * k, c),
      params["dw_scale"].reshape(1, c),
      params["dw_bias"].reshape(1, c),
      params["se_w1"],
      params["se_b1"].reshape(1, cs),
      params["se_w2"],
      params["se_b2"].reshape(1, c))

    # ---- Kernel 2: SE-gated 1x1 pointwise conv + BN (channel-major output) ----
    tm = hw if hw <= 2048 else 2048
    # TODO(synk): store bf16 here if the downstream consumer tolerates it.
    out = pl.pallas_call(
        _pw_gate_kernel,
        grid=(n, pl.cdiv(hw, tm)),
        in_specs=[
            pl.BlockSpec((1, c, tm), lambda b, m: (b, 0, m)),
            pl.BlockSpec((1, 1, c), lambda b, m: (b, 0, 0)),
            pl.BlockSpec((cout, c), lambda b, m: (0, 0)),
            pl.BlockSpec((cout, 1), lambda b, m: (0, 0)),
            pl.BlockSpec((cout, 1), lambda b, m: (0, 0)),
        ],
        out_specs=pl.BlockSpec((1, cout, tm), lambda b, m: (b, 0, m)),
        out_shape=jax.ShapeDtypeStruct((n, cout, hw), jnp.float32),
        compiler_params=pltpu.CompilerParams(
            dimension_semantics=("parallel", "parallel"),
            vmem_limit_bytes=vmem),
    )(y, gate,
      jnp.transpose(params["pw_w"]),
      params["pw_scale"].reshape(cout, 1),
      params["pw_bias"].reshape(cout, 1))

    # Already channel-major: NCHW is a free reshape (no transpose pass).
    return out.reshape(n, cout, ho, wo)


# ----------------------------------------------------------------------------
# Parameter construction + pure-JAX reference (for correctness check)
# ----------------------------------------------------------------------------

def build_params(key, in_ch, sq_ch, out_ch, k):
    ks = jax.random.split(key, 6)
    params = {}
    params["dw_w"] = jax.random.normal(ks[0], (k, k, in_ch), jnp.float32) \
        * math.sqrt(2.0 / (k * k))
    params["dw_scale"], params["dw_bias"] = _bn_fold(in_ch)
    r1 = 1.0 / math.sqrt(in_ch)
    params["se_w1"] = jax.random.uniform(ks[1], (in_ch, sq_ch), jnp.float32, -r1, r1)
    params["se_b1"] = jax.random.uniform(ks[2], (sq_ch,), jnp.float32, -r1, r1)
    r2 = 1.0 / math.sqrt(sq_ch)
    params["se_w2"] = jax.random.uniform(ks[3], (sq_ch, in_ch), jnp.float32, -r2, r2)
    params["se_b2"] = jax.random.uniform(ks[4], (in_ch,), jnp.float32, -r2, r2)
    params["pw_w"] = jax.random.normal(ks[5], (in_ch, out_ch), jnp.float32) \
        * math.sqrt(2.0 / out_ch)
    params["pw_scale"], params["pw_bias"] = _bn_fold(out_ch)
    return params


def ref_forward(params, x_nchw, *, k, stride):
    x = jnp.transpose(x_nchw, (0, 2, 3, 1)).astype(jnp.float32)
    n, h, w, c = x.shape
    p = (k - 1) // 2
    rhs = params["dw_w"].reshape(k, k, 1, c)
    y = jax.lax.conv_general_dilated(
        x, rhs, window_strides=(stride, stride), padding=((p, p), (p, p)),
        dimension_numbers=("NHWC", "HWIO", "NHWC"), feature_group_count=c)
    y = y * params["dw_scale"] + params["dw_bias"]
    y = y * jax.nn.sigmoid(y)
    pooled = jnp.mean(y, axis=(1, 2))
    hid = pooled @ params["se_w1"] + params["se_b1"]
    hid = hid * jax.nn.sigmoid(hid)
    g = jax.nn.sigmoid(hid @ params["se_w2"] + params["se_b2"])
    y = y * g[:, None, None, :]
    out = jnp.einsum("nhwc,co->nhwo", y, params["pw_w"])
    out = out * params["pw_scale"] + params["pw_bias"]
    return jnp.transpose(out, (0, 3, 1, 2))


# ----------------------------------------------------------------------------

if __name__ == "__main__":
    key = jax.random.PRNGKey(0)
    pkey, xkey = jax.random.split(key)

    batch, in_ch, sq_ch, out_ch, spatial = 2, 16, 4, 32, 16
    x = jax.random.normal(xkey, (batch, in_ch, spatial, spatial), jnp.float32)

    # (k, stride, row_tile): exercise the multi-row-tile path (stride-1, 2 tiles)
    # and the strided / whole-image path (stride-2, auto tile).
    configs = [(3, 1, 8), (5, 2, None)]
    for (k, stride, rt), sub in zip(configs, jax.random.split(pkey, len(configs))):
        params = build_params(sub, in_ch, sq_ch, out_ch, k)
        out = dep_se_sep_forward(params, x, k=k, stride=stride, row_tile=rt)
        out = jax.block_until_ready(out)

        ref = ref_forward(params, x, k=k, stride=stride)
        assert out.shape == ref.shape, (out.shape, ref.shape)
        assert bool(jnp.all(jnp.isfinite(out)))
        max_err = float(jnp.max(jnp.abs(out - ref)))
        assert bool(jnp.allclose(out, ref, atol=5e-2, rtol=5e-2)), \
            f"mismatch (k={k}, stride={stride}): max_abs_err={max_err}"

    print("KERNEL_OK")
</pallas_src>

<mosaic_0001>
module attributes {stable_mosaic.version = 11 : i64} {
  func.func @_dw_se_kernel(%arg0: i32, %arg1: i32, %arg2: memref<1x10x18x16xbf16, #tpu.memory_space<vmem>>, %arg3: memref<9x16xf32, #tpu.memory_space<vmem>>, %arg4: memref<1x16xf32, #tpu.memory_space<vmem>>, %arg5: memref<1x16xf32, #tpu.memory_space<vmem>>, %arg6: memref<16x4xf32, #tpu.memory_space<vmem>>, %arg7: memref<1x4xf32, #tpu.memory_space<vmem>>, %arg8: memref<4x16xf32, #tpu.memory_space<vmem>>, %arg9: memref<1x16xf32, #tpu.memory_space<vmem>>, %arg10: memref<1x16x128xbf16, #tpu.memory_space<vmem>>, %arg11: memref<1x1x16xf32, #tpu.memory_space<vmem>>, %arg12: memref<1x16xf32, #tpu.memory_space<vmem>>) attributes {dimension_semantics = [#tpu.dimension_semantics<parallel>, #tpu.dimension_semantics<arbitrary>], iteration_bounds = array<i64: 2, 2>, scalar_prefetch = 0 : i64, scratch_operands = 1 : i64, tpu.core_type = #tpu.core_type<tc>, window_params = [{transform_indices = @transform_0, window_bounds = array<i64: 1, 10, 18, 16>}, {pipeline_mode = #tpu.pipeline_mode<synchronous>, transform_indices = @transform_1, window_bounds = array<i64: 9, 16>}, {pipeline_mode = #tpu.pipeline_mode<synchronous>, transform_indices = @transform_2, window_bounds = array<i64: 1, 16>}, {pipeline_mode = #tpu.pipeline_mode<synchronous>, transform_indices = @transform_3, window_bounds = array<i64: 1, 16>}, {pipeline_mode = #tpu.pipeline_mode<synchronous>, transform_indices = @transform_4, window_bounds = array<i64: 16, 4>}, {pipeline_mode = #tpu.pipeline_mode<synchronous>, transform_indices = @transform_5, window_bounds = array<i64: 1, 4>}, {pipeline_mode = #tpu.pipeline_mode<synchronous>, transform_indices = @transform_6, window_bounds = array<i64: 4, 16>}, {pipeline_mode = #tpu.pipeline_mode<synchronous>, transform_indices = @transform_7, window_bounds = array<i64: 1, 16>}, {transform_indices = @transform_8, window_bounds = array<i64: 1, 16, 128>}, {transform_indices = @transform_9, window_bounds = array<i64: 1, 1, 16>}]} {
    %c0_i32 = arith.constant 0 : i32
    %0 = arith.cmpi eq, %arg1, %c0_i32 : i32
    %1 = arith.extui %0 : i1 to i32
    %c0_i32_0 = arith.constant 0 : i32
    %2 = arith.cmpi ne, %1, %c0_i32_0 : i32
    scf.if %2 {
      %cst_52 = arith.constant 0.000000e+00 : f32
      %116 = vector.broadcast %cst_52 : f32 to vector<1x16xf32>
      %c0_53 = arith.constant 0 : index
      %c0_54 = arith.constant 0 : index
      %117 = vector.load %arg12[%c0_53, %c0_54] : memref<1x16xf32, #tpu.memory_space<vmem>>, vector<1x16xf32>
      tpu.vector_store %arg12[%c0_53, %c0_54], %116 {strides = array<i32>} : memref<1x16xf32, #tpu.memory_space<vmem>>, vector<1x16xf32>,
    } else {
    }
    %c0 = arith.constant 0 : index
    %c0_1 = arith.constant 0 : index
    %3 = vector.load %arg3[%c0, %c0_1] : memref<9x16xf32, #tpu.memory_space<vmem>>, vector<9x16xf32>
    %cst = arith.constant 0.000000e+00 : f32
    %4 = vector.broadcast %cst : f32 to vector<8x16x16xf32>
    %c0_2 = arith.constant 0 : index
    %c0_3 = arith.constant 0 : index
    %c0_4 = arith.constant 0 : index
    %c0_5 = arith.constant 0 : index
    %5 = vector.load %arg2[%c0_2, %c0_3, %c0_4, %c0_5] : memref<1x10x18x16xbf16, #tpu.memory_space<vmem>>, vector<1x8x16x16xbf16>
    %6 = vector.shape_cast %5 : vector<1x8x16x16xbf16> to vector<8x16x16xbf16>
    %7 = arith.extf %6 : vector<8x16x16xbf16> to vector<8x16x16xf32>
    %8 = vector.extract_strided_slice %3 {offsets = [0, 0], sizes = [1, 16], strides = [1, 1]} : vector<9x16xf32> to vector<1x16xf32>
    %9 = vector.shape_cast %8 : vector<1x16xf32> to vector<16xf32>
    %10 = vector.shape_cast %9 : vector<16xf32> to vector<1x1x16xf32>
    %11 = vector.broadcast %10 : vector<1x1x16xf32> to vector<8x16x16xf32>
    %12 = arith.mulf %7, %11 : vector<8x16x16xf32>
    %13 = arith.addf %4, %12 : vector<8x16x16xf32>
    %c0_6 = arith.constant 0 : index
    %c0_7 = arith.constant 0 : index
    %c1 = arith.constant 1 : index
    %c0_8 = arith.constant 0 : index
    %14 = vector.load %arg2[%c0_6, %c0_7, %c1, %c0_8] : memref<1x10x18x16xbf16, #tpu.memory_space<vmem>>, vector<1x8x16x16xbf16>
    %15 = vector.shape_cast %14 : vector<1x8x16x16xbf16> to vector<8x16x16xbf16>
    %16 = arith.extf %15 : vector<8x16x16xbf16> to vector<8x16x16xf32>
    %17 = vector.extract_strided_slice %3 {offsets = [1, 0], sizes = [1, 16], strides = [1, 1]} : vector<9x16xf32> to vector<1x16xf32>
    %18 = vector.shape_cast %17 : vector<1x16xf32> to vector<16xf32>
    %19 = vector.shape_cast %18 : vector<16xf32> to vector<1x1x16xf32>
    %20 = vector.broadcast %19 : vector<1x1x16xf32> to vector<8x16x16xf32>
    %21 = arith.mulf %16, %20 : vector<8x16x16xf32>
    %22 = arith.addf %13, %21 : vector<8x16x16xf32>
    %c0_9 = arith.constant 0 : index
    %c0_10 = arith.constant 0 : index
    %c2 = arith.constant 2 : index
    %c0_11 = arith.constant 0 : index
    %23 = vector.load %arg2[%c0_9, %c0_10, %c2, %c0_11] : memref<1x10x18x16xbf16, #tpu.memory_space<vmem>>, vector<1x8x16x16xbf16>
    %24 = vector.shape_cast %23 : vector<1x8x16x16xbf16> to vector<8x16x16xbf16>
    %25 = arith.extf %24 : vector<8x16x16xbf16> to vector<8x16x16xf32>
    %26 = vector.extract_strided_slice %3 {offsets = [2, 0], sizes = [1, 16], strides = [1, 1]} : vector<9x16xf32> to vector<1x16xf32>
    %27 = vector.shape_cast %26 : vector<1x16xf32> to vector<16xf32>
    %28 = vector.shape_cast %27 : vector<16xf32> to vector<1x1x16xf32>
    %29 = vector.broadcast %28 : vector<1x1x16xf32> to vector<8x16x16xf32>
    %30 = arith.mulf %25, %29 : vector<8x16x16xf32>
    %31 = arith.addf %22, %30 : vector<8x16x16xf32>
    %c0_12 = arith.constant 0 : index
    %c1_13 = arith.constant 1 : index
    %c0_14 = arith.constant 0 : index
    %c0_15 = arith.constant 0 : index
    %32 = vector.load %arg2[%c0_12, %c1_13, %c0_14, %c0_15] : memref<1x10x18x16xbf16, #tpu.memory_space<vmem>>, vector<1x8x16x16xbf16>
    %33 = vector.shape_cast %32 : vector<1x8x16x16xbf16> to vector<8x16x16xbf16>
    %34 = arith.extf %33 : vector<8x16x16xbf16> to vector<8x16x16xf32>
    %35 = vector.extract_strided_slice %3 {offsets = [3, 0], sizes = [1, 16], strides = [1, 1]} : vector<9x16xf32> to vector<1x16xf32>
    %36 = vector.shape_cast %35 : vector<1x16xf32> to vector<16xf32>
    %37 = vector.shape_cast %36 : vector<16xf32> to vector<1x1x16xf32>
    %38 = vector.broadcast %37 : vector<1x1x16xf32> to vector<8x16x16xf32>
    %39 = arith.mulf %34, %38 : vector<8x16x16xf32>
    %40 = arith.addf %31, %39 : vector<8x16x16xf32>
    %c0_16 = arith.constant 0 : index
    %c1_17 = arith.constant 1 : index
    %c1_18 = arith.constant 1 : index
    %c0_19 = arith.constant 0 : index
    %41 = vector.load %arg2[%c0_16, %c1_17, %c1_18, %c0_19] : memref<1x10x18x16xbf16, #tpu.memory_space<vmem>>, vector<1x8x16x16xbf16>
    %42 = vector.shape_cast %41 : vector<1x8x16x16xbf16> to vector<8x16x16xbf16>
    %43 = arith.extf %42 : vector<8x16x16xbf16> to vector<8x16x16xf32>
    %44 = vector.extract_strided_slice %3 {offsets = [4, 0], sizes = [1, 16], strides = [1, 1]} : vector<9x16xf32> to vector<1x16xf32>
    %45 = vector.shape_cast %44 : vector<1x16xf32> to vector<16xf32>
    %46 = vector.shape_cast %45 : vector<16xf32> to vector<1x1x16xf32>
    %47 = vector.broadcast %46 : vector<1x1x16xf32> to vector<8x16x16xf32>
    %48 = arith.mulf %43, %47 : vector<8x16x16xf32>
    %49 = arith.addf %40, %48 : vector<8x16x16xf32>
    %c0_20 = arith.constant 0 : index
    %c1_21 = arith.constant 1 : index
    %c2_22 = arith.constant 2 : index
    %c0_23 = arith.constant 0 : index
    %50 = vector.load %arg2[%c0_20, %c1_21, %c2_22, %c0_23] : memref<1x10x18x16xbf16, #tpu.memory_space<vmem>>, vector<1x8x16x16xbf16>
    %51 = vector.shape_cast %50 : vector<1x8x16x16xbf16> to vector<8x16x16xbf16>
    %52 = arith.extf %51 : vector<8x16x16xbf16> to vector<8x16x16xf32>
    %53 = vector.extract_strided_slice %3 {offsets = [5, 0], sizes = [1, 16], strides = [1, 1]} : vector<9x16xf32> to vector<1x16xf32>
    %54 = vector.shape_cast %53 : vector<1x16xf32> to vector<16xf32>
    %55 = vector.shape_cast %54 : vector<16xf32> to vector<1x1x16xf32>
    %56 = vector.broadcast %55 : vector<1x1x16xf32> to vector<8x16x16xf32>
    %57 = arith.mulf %52, %56 : vector<8x16x16xf32>
    %58 = arith.addf %49, %57 : vector<8x16x16xf32>
    %c0_24 = arith.constant 0 : index
    %c2_25 = arith.constant 2 : index
    %c0_26 = arith.constant 0 : index
    %c0_27 = arith.constant 0 : index
    %59 = vector.load %arg2[%c0_24, %c2_25, %c0_26, %c0_27] : memref<1x10x18x16xbf16, #tpu.memory_space<vmem>>, vector<1x8x16x16xbf16>
    %60 = vector.shape_cast %59 : vector<1x8x16x16xbf16> to vector<8x16x16xbf16>
    %61 = arith.extf %60 : vector<8x16x16xbf16> to vector<8x16x16xf32>
    %62 = vector.extract_strided_slice %3 {offsets = [6, 0], sizes = [1, 16], strides = [1, 1]} : vector<9x16xf32> to vector<1x16xf32>
    %63 = vector.shape_cast %62 : vector<1x16xf32> to vector<16xf32>
    %64 = vector.shape_cast %63 : vector<16xf32> to vector<1x1x16xf32>
    %65 = vector.broadcast %64 : vector<1x1x16xf32> to vector<8x16x16xf32>
    %66 = arith.mulf %61, %65 : vector<8x16x16xf32>
    %67 = arith.addf %58, %66 : vector<8x16x16xf32>
    %c0_28 = arith.constant 0 : index
    %c2_29 = arith.constant 2 : index
    %c1_30 = arith.constant 1 : index
    %c0_31 = arith.constant 0 : index
    %68 = vector.load %arg2[%c0_28, %c2_29, %c1_30, %c0_31] : memref<1x10x18x16xbf16, #tpu.memory_space<vmem>>, vector<1x8x16x16xbf16>
    %69 = vector.shape_cast %68 : vector<1x8x16x16xbf16> to vector<8x16x16xbf16>
    %70 = arith.extf %69 : vector<8x16x16xbf16> to vector<8x16x16xf32>
    %71 = vector.extract_strided_slice %3 {offsets = [7, 0], sizes = [1, 16], strides = [1, 1]} : vector<9x16xf32> to vector<1x16xf32>
    %72 = vector.shape_cast %71 : vector<1x16xf32> to vector<16xf32>
    %73 = vector.shape_cast %72 : vector<16xf32> to vector<1x1x16xf32>
    %74 = vector.broadcast %73 : vector<1x1x16xf32> to vector<8x16x16xf32>
    %75 = arith.mulf %70, %74 : vector<8x16x16xf32>
    %76 = arith.addf %67, %75 : vector<8x16x16xf32>
    %c0_32 = arith.constant 0 : index
    %c2_33 = arith.constant 2 : index
    %c2_34 = arith.constant 2 : index
    %c0_35 = arith.constant 0 : index
    %77 = vector.load %arg2[%c0_32, %c2_33, %c2_34, %c0_35] : memref<1x10x18x16xbf16, #tpu.memory_space<vmem>>, vector<1x8x16x16xbf16>
    %78 = vector.shape_cast %77 : vector<1x8x16x16xbf16> to vector<8x16x16xbf16>
    %79 = arith.extf %78 : vector<8x16x16xbf16> to vector<8x16x16xf32>
    %80 = vector.extract_strided_slice %3 {offsets = [8, 0], sizes = [1, 16], strides = [1, 1]} : vector<9x16xf32> to vector<1x16xf32>
    %81 = vector.shape_cast %80 : vector<1x16xf32> to vector<16xf32>
    %82 = vector.shape_cast %81 : vector<16xf32> to vector<1x1x16xf32>
    %83 = vector.broadcast %82 : vector<1x1x16xf32> to vector<8x16x16xf32>
    %84 = arith.mulf %79, %83 : vector<8x16x16xf32>
    %85 = arith.addf %76, %84 : vector<8x16x16xf32>
    %c0_36 = arith.constant 0 : index
    %c0_37 = arith.constant 0 : index
    %86 = vector.load %arg4[%c0_36, %c0_37] : memref<1x16xf32, #tpu.memory_space<vmem>>, vector<1x16xf32>
    %87 = vector.shape_cast %86 : vector<1x16xf32> to vector<1x1x16xf32>
    %88 = vector.broadcast %87 : vector<1x1x16xf32> to vector<8x16x16xf32>
    %89 = arith.mulf %85, %88 : vector<8x16x16xf32>
    %c0_38 = arith.constant 0 : index
    %c0_39 = arith.constant 0 : index
    %90 = vector.load %arg5[%c0_38, %c0_39] : memref<1x16xf32, #tpu.memory_space<vmem>>, vector<1x16xf32>
    %91 = vector.shape_cast %90 : vector<1x16xf32> to vector<1x1x16xf32>
    %92 = vector.broadcast %91 : vector<1x1x16xf32> to vector<8x16x16xf32>
    %93 = arith.addf %89, %92 : vector<8x16x16xf32>
    %cst_40 = arith.constant 5.000000e-01 : f32
    %94 = vector.broadcast %cst_40 : f32 to vector<8x16x16xf32>
    %95 = arith.mulf %94, %93 : vector<8x16x16xf32>
    %96 = math.tanh %95 : vector<8x16x16xf32>
    %cst_41 = arith.constant 5.000000e-01 : f32
    %97 = vector.broadcast %cst_41 : f32 to vector<8x16x16xf32>
    %98 = arith.mulf %97, %96 : vector<8x16x16xf32>
    %cst_42 = arith.constant 5.000000e-01 : f32
    %99 = vector.broadcast %cst_42 : f32 to vector<8x16x16xf32>
    %100 = arith.addf %98, %99 : vector<8x16x16xf32>
    %101 = arith.mulf %93, %100 : vector<8x16x16xf32>
    %102 = vector.shape_cast %101 : vector<8x16x16xf32> to vector<128x16xf32>
    %c0_43 = arith.constant 0 : index
    %c0_44 = arith.constant 0 : index
    %103 = vector.load %arg12[%c0_43, %c0_44] : memref<1x16xf32, #tpu.memory_space<vmem>>, vector<1x16xf32>
    %cst_45 = arith.constant dense<0.000000e+00> : vector<16xf32>
    %104 = vector.multi_reduction <add>, %102, %cst_45 [0] : vector<128x16xf32> to vector<16xf32>
    %105 = vector.shape_cast %104 : vector<16xf32> to vector<1x16xf32>
    %106 = arith.addf %103, %105 : vector<1x16xf32>
    %c0_46 = arith.constant 0 : index
    %c0_47 = arith.constant 0 : index
    %107 = vector.load %arg12[%c0_46, %c0_47] : memref<1x16xf32, #tpu.memory_space<vmem>>, vector<1x16xf32>
    tpu.vector_store %arg12[%c0_46, %c0_47], %106 {strides = array<i32>} : memref<1x16xf32, #tpu.memory_space<vmem>>, vector<1x16xf32>,
    %108 = tpu.transpose %102, [1, 0] : vector<128x16xf32> -> vector<16x128xf32>
    %109 = arith.truncf %108 : vector<16x128xf32> to vector<16x128xbf16>
    %c0_48 = arith.constant 0 : index
    %c0_49 = arith.constant 0 : index
    %c0_50 = arith.constant 0 : index
    %110 = vector.load %arg10[%c0_48, %c0_49, %c0_50] : memref<1x16x128xbf16, #tpu.memory_space<vmem>>, vector<1x16x128xbf16>
    %111 = vector.shape_cast %110 : vector<1x16x128xbf16> to vector<16x128xbf16>
    %112 = vector.shape_cast %109 : vector<16x128xbf16> to vector<1x16x128xbf16>
    tpu.vector_store %arg10[%c0_48, %c0_49, %c0_50], %112 {strides = array<i32>} : memref<1x16x128xbf16, #tpu.memory_space<vmem>>, vector<1x16x128xbf16>,
    %c1_i32 = arith.constant 1 : i32
    %113 = arith.cmpi eq, %arg1, %c1_i32 : i32
    %114 = arith.extui %113 : i1 to i32
    %c0_i32_51 = arith.constant 0 : i32
    %115 = arith.cmpi ne, %114, %c0_i32_51 : i32
    scf.if %115 {
      %c0_52 = arith.constant 0 : index
      %c0_53 = arith.constant 0 : index
      %116 = vector.load %arg12[%c0_52, %c0_53] : memref<1x16xf32, #tpu.memory_space<vmem>>, vector<1x16xf32>
      %cst_54 = arith.constant 3.906250e-03 : f32
      %117 = vector.broadcast %cst_54 : f32 to vector<1x16xf32>
      %118 = arith.mulf %116, %117 : vector<1x16xf32>
      %c0_55 = arith.constant 0 : index
      %c0_56 = arith.constant 0 : index
      %119 = vector.load %arg6[%c0_55, %c0_56] : memref<16x4xf32, #tpu.memory_space<vmem>>, vector<16x4xf32>
      %cst_57 = arith.constant dense<0.000000e+00> : vector<1x4xf32>
      %120 = tpu.matmul %118, %119, %cst_57 {dimension_numbers = #tpu.dot_dimension_numbers<[1], [0], [0], [1], [0, 0, 1, 1], [], []>} : vector<1x16xf32>, vector<16x4xf32>, vector<1x4xf32> -> vector<1x4xf32>
      %c0_58 = arith.constant 0 : index
      %c0_59 = arith.constant 0 : index
      %121 = vector.load %arg7[%c0_58, %c0_59] : memref<1x4xf32, #tpu.memory_space<vmem>>, vector<1x4xf32>
      %122 = arith.addf %120, %121 : vector<1x4xf32>
      %cst_60 = arith.constant 5.000000e-01 : f32
      %123 = vector.broadcast %cst_60 : f32 to vector<1x4xf32>
      %124 = arith.mulf %123, %122 : vector<1x4xf32>
      %125 = math.tanh %124 : vector<1x4xf32>
      %cst_61 = arith.constant 5.000000e-01 : f32
      %126 = vector.broadcast %cst_61 : f32 to vector<1x4xf32>
      %127 = arith.mulf %126, %125 : vector<1x4xf32>
      %cst_62 = arith.constant 5.000000e-01 : f32
      %128 = vector.broadcast %cst_62 : f32 to vector<1x4xf32>
      %129 = arith.addf %127, %128 : vector<1x4xf32>
      %130 = arith.mulf %122, %129 : vector<1x4xf32>
      %c0_63 = arith.constant 0 : index
      %c0_64 = arith.constant 0 : index
      %131 = vector.load %arg8[%c0_63, %c0_64] : memref<4x16xf32, #tpu.memory_space<vmem>>, vector<4x16xf32>
      %cst_65 = arith.constant dense<0.000000e+00> : vector<1x16xf32>
      %132 = tpu.matmul %130, %131, %cst_65 {dimension_numbers = #tpu.dot_dimension_numbers<[1], [0], [0], [1], [0, 0, 1, 1], [], []>} : vector<1x4xf32>, vector<4x16xf32>, vector<1x16xf32> -> vector<1x16xf32>
      %c0_66 = arith.constant 0 : index
      %c0_67 = arith.constant 0 : index
      %133 = vector.load %arg9[%c0_66, %c0_67] : memref<1x16xf32, #tpu.memory_space<vmem>>, vector<1x16xf32>
      %134 = arith.addf %132, %133 : vector<1x16xf32>
      %cst_68 = arith.constant 5.000000e-01 : f32
      %135 = vector.broadcast %cst_68 : f32 to vector<1x16xf32>
      %136 = arith.mulf %135, %134 : vector<1x16xf32>
      %137 = math.tanh %136 : vector<1x16xf32>
      %cst_69 = arith.constant 5.000000e-01 : f32
      %138 = vector.broadcast %cst_69 : f32 to vector<1x16xf32>
      %139 = arith.mulf %138, %137 : vector<1x16xf32>
      %cst_70 = arith.constant 5.000000e-01 : f32
      %140 = vector.broadcast %cst_70 : f32 to vector<1x16xf32>
      %141 = arith.addf %139, %140 : vector<1x16xf32>
      %142 = vector.shape_cast %141 : vector<1x16xf32> to vector<1x1x16xf32>
      %c0_71 = arith.constant 0 : index
      %c0_72 = arith.constant 0 : index
      %c0_73 = arith.constant 0 : index
      %143 = vector.load %arg11[%c0_71, %c0_72, %c0_73] : memref<1x1x16xf32, #tpu.memory_space<vmem>>, vector<1x1x16xf32>
      tpu.vector_store %arg11[%c0_71, %c0_72, %c0_73], %142 {strides = array<i32>} : memref<1x1x16xf32, #tpu.memory_space<vmem>>, vector<1x1x16xf32>,
    } else {
    }
    return
  }
  func.func @transform_0(%arg0: i32, %arg1: i32) -> (i32, i32, i32, i32) {
    %c2_i32 = arith.constant 2 : i32
    %0 = arith.muli %arg0, %c2_i32 : i32
    %1 = arith.addi %0, %arg1 : i32
    %c0_i32 = arith.constant 0 : i32
    %c0_i32_0 = arith.constant 0 : i32
    %c0_i32_1 = arith.constant 0 : i32
    %c0_i32_2 = arith.constant 0 : i32
    return %1, %c0_i32, %c0_i32_0, %c0_i32_1 : i32, i32, i32, i32
  }
  func.func @transform_1(%arg0: i32, %arg1: i32) -> (i32, i32) {
    %c0_i32 = arith.constant 0 : i32
    %c0_i32_0 = arith.constant 0 : i32
    %c0_i32_1 = arith.constant 0 : i32
    return %c0_i32, %c0_i32_0 : i32, i32
  }
  func.func @transform_2(%arg0: i32, %arg1: i32) -> (i32, i32) {
    %c0_i32 = arith.constant 0 : i32
    %c0_i32_0 = arith.constant 0 : i32
    %c0_i32_1 = arith.constant 0 : i32
    return %c0_i32, %c0_i32_0 : i32, i32
  }
  func.func @transform_3(%arg0: i32, %arg1: i32) -> (i32, i32) {
    %c0_i32 = arith.constant 0 : i32
    %c0_i32_0 = arith.constant 0 : i32
    %c0_i32_1 = arith.constant 0 : i32
    return %c0_i32, %c0_i32_0 : i32, i32
  }
  func.func @transform_4(%arg0: i32, %arg1: i32) -> (i32, i32) {
    %c0_i32 = arith.constant 0 : i32
    %c0_i32_0 = arith.constant 0 : i32
    %c0_i32_1 = arith.constant 0 : i32
    return %c0_i32, %c0_i32_0 : i32, i32
  }
  func.func @transform_5(%arg0: i32, %arg1: i32) -> (i32, i32) {
    %c0_i32 = arith.constant 0 : i32
    %c0_i32_0 = arith.constant 0 : i32
    %c0_i32_1 = arith.constant 0 : i32
    return %c0_i32, %c0_i32_0 : i32, i32
  }
  func.func @transform_6(%arg0: i32, %arg1: i32) -> (i32, i32) {
    %c0_i32 = arith.constant 0 : i32
    %c0_i32_0 = arith.constant 0 : i32
    %c0_i32_1 = arith.constant 0 : i32
    return %c0_i32, %c0_i32_0 : i32, i32
  }
  func.func @transform_7(%arg0: i32, %arg1: i32) -> (i32, i32) {
    %c0_i32 = arith.constant 0 : i32
    %c0_i32_0 = arith.constant 0 : i32
    %c0_i32_1 = arith.constant 0 : i32
    return %c0_i32, %c0_i32_0 : i32, i32
  }
  func.func @transform_8(%arg0: i32, %arg1: i32) -> (i32, i32, i32) {
    %c0_i32 = arith.constant 0 : i32
    %c0_i32_0 = arith.constant 0 : i32
    return %arg0, %c0_i32, %arg1 : i32, i32, i32
  }
  func.func @transform_9(%arg0: i32, %arg1: i32) -> (i32, i32, i32) {
    %c0_i32 = arith.constant 0 : i32
    %c0_i32_0 = arith.constant 0 : i32
    %c0_i32_1 = arith.constant 0 : i32
    return %arg0, %c0_i32, %c0_i32_0 : i32, i32, i32
  }
}

module attributes {stable_mosaic.version = 11 : i64} {
  func.func @_pw_gate_kernel(%arg0: i32, %arg1: i32, %arg2: memref<1x16x256xbf16, #tpu.memory_space<vmem>>, %arg3: memref<1x1x16xf32, #tpu.memory_space<vmem>>, %arg4: memref<32x16xf32, #tpu.memory_space<vmem>>, %arg5: memref<32x1xf32, #tpu.memory_space<vmem>>, %arg6: memref<32x1xf32, #tpu.memory_space<vmem>>, %arg7: memref<1x32x256xf32, #tpu.memory_space<vmem>>) attributes {dimension_semantics = [#tpu.dimension_semantics<parallel>, #tpu.dimension_semantics<parallel>], iteration_bounds = array<i64: 2, 1>, scalar_prefetch = 0 : i64, scratch_operands = 0 : i64, tpu.core_type = #tpu.core_type<tc>, window_params = [{transform_indices = @transform_0, window_bounds = array<i64: 1, 16, 256>}, {transform_indices = @transform_1, window_bounds = array<i64: 1, 1, 16>}, {pipeline_mode = #tpu.pipeline_mode<synchronous>, transform_indices = @transform_2, window_bounds = array<i64: 32, 16>}, {pipeline_mode = #tpu.pipeline_mode<synchronous>, transform_indices = @transform_3, window_bounds = array<i64: 32, 1>}, {pipeline_mode = #tpu.pipeline_mode<synchronous>, transform_indices = @transform_4, window_bounds = array<i64: 32, 1>}, {transform_indices = @transform_5, window_bounds = array<i64: 1, 32, 256>}]} {
    %c0 = arith.constant 0 : index
    %c0_0 = arith.constant 0 : index
    %0 = vector.load %arg4[%c0, %c0_0] : memref<32x16xf32, #tpu.memory_space<vmem>>, vector<32x16xf32>
    %c0_1 = arith.constant 0 : index
    %c0_2 = arith.constant 0 : index
    %c0_3 = arith.constant 0 : index
    %1 = vector.load %arg3[%c0_1, %c0_2, %c0_3] : memref<1x1x16xf32, #tpu.memory_space<vmem>>, vector<1x1x16xf32>
    %2 = vector.shape_cast %1 : vector<1x1x16xf32> to vector<1x16xf32>
    %3 = vector.broadcast %2 : vector<1x16xf32> to vector<32x16xf32>
    %4 = arith.mulf %0, %3 : vector<32x16xf32>
    %5 = arith.truncf %4 : vector<32x16xf32> to vector<32x16xbf16>
    %c0_4 = arith.constant 0 : index
    %c0_5 = arith.constant 0 : index
    %c0_6 = arith.constant 0 : index
    %6 = vector.load %arg2[%c0_4, %c0_5, %c0_6] : memref<1x16x256xbf16, #tpu.memory_space<vmem>>, vector<1x16x256xbf16>
    %7 = vector.shape_cast %6 : vector<1x16x256xbf16> to vector<16x256xbf16>
    %cst = arith.constant dense<0.000000e+00> : vector<32x256xf32>
    %8 = tpu.matmul %5, %7, %cst {dimension_numbers = #tpu.dot_dimension_numbers<[1], [0], [0], [1], [0, 0, 1, 1], [], []>} : vector<32x16xbf16>, vector<16x256xbf16>, vector<32x256xf32> -> vector<32x256xf32>
    %c0_7 = arith.constant 0 : index
    %c0_8 = arith.constant 0 : index
    %9 = vector.load %arg5[%c0_7, %c0_8] : memref<32x1xf32, #tpu.memory_space<vmem>>, vector<32x1xf32>
    %10 = vector.broadcast %9 : vector<32x1xf32> to vector<32x256xf32>
    %11 = arith.mulf %8, %10 : vector<32x256xf32>
    %c0_9 = arith.constant 0 : index
    %c0_10 = arith.constant 0 : index
    %12 = vector.load %arg6[%c0_9, %c0_10] : memref<32x1xf32, #tpu.memory_space<vmem>>, vector<32x1xf32>
    %13 = vector.broadcast %12 : vector<32x1xf32> to vector<32x256xf32>
    %14 = arith.addf %11, %13 : vector<32x256xf32>
    %c0_11 = arith.constant 0 : index
    %c0_12 = arith.constant 0 : index
    %c0_13 = arith.constant 0 : index
    %15 = vector.load %arg7[%c0_11, %c0_12, %c0_13] : memref<1x32x256xf32, #tpu.memory_space<vmem>>, vector<1x32x256xf32>
    %16 = vector.shape_cast %15 : vector<1x32x256xf32> to vector<32x256xf32>
    %17 = vector.shape_cast %14 : vector<32x256xf32> to vector<1x32x256xf32>
    tpu.vector_store %arg7[%c0_11, %c0_12, %c0_13], %17 {strides = array<i32>} : memref<1x32x256xf32, #tpu.memory_space<vmem>>, vector<1x32x256xf32>,
    return
  }
  func.func @transform_0(%arg0: i32, %arg1: i32) -> (i32, i32, i32) {
    %c0_i32 = arith.constant 0 : i32
    %c0_i32_0 = arith.constant 0 : i32
    return %arg0, %c0_i32, %arg1 : i32, i32, i32
  }
  func.func @transform_1(%arg0: i32, %arg1: i32) -> (i32, i32, i32) {
    %c0_i32 = arith.constant 0 : i32
    %c0_i32_0 = arith.constant 0 : i32
    %c0_i32_1 = arith.constant 0 : i32
    return %arg0, %c0_i32, %c0_i32_0 : i32, i32, i32
  }
  func.func @transform_2(%arg0: i32, %arg1: i32) -> (i32, i32) {
    %c0_i32 = arith.constant 0 : i32
    %c0_i32_0 = arith.constant 0 : i32
    %c0_i32_1 = arith.constant 0 : i32
    return %c0_i32, %c0_i32_0 : i32, i32
  }
  func.func @transform_3(%arg0: i32, %arg1: i32) -> (i32, i32) {
    %c0_i32 = arith.constant 0 : i32
    %c0_i32_0 = arith.constant 0 : i32
    %c0_i32_1 = arith.constant 0 : i32
    return %c0_i32, %c0_i32_0 : i32, i32
  }
  func.func @transform_4(%arg0: i32, %arg1: i32) -> (i32, i32) {
    %c0_i32 = arith.constant 0 : i32
    %c0_i32_0 = arith.constant 0 : i32
    %c0_i32_1 = arith.constant 0 : i32
    return %c0_i32, %c0_i32_0 : i32, i32
  }
  func.func @transform_5(%arg0: i32, %arg1: i32) -> (i32, i32, i32) {
    %c0_i32 = arith.constant 0 : i32
    %c0_i32_0 = arith.constant 0 : i32
    return %arg0, %c0_i32, %arg1 : i32, i32, i32
  }
}

</mosaic_0001>

<bundles_post_ra>
// kernel: dep_se_sep_forward.3
= control target key start
LH: loop header
LB: loop body
LE: loop exit
PB: predicated region body
PF: predicated region fallthrough
CT: control target
= control target key end

     0   :  { %s641_s18 = smov 0   ;;  %s643_s19 = smov 0   ;;  %s718_s0 = inlined_call_operand.vmem [shape: bf16[2,16,256], index: 0, kind: input, shape index: {}]   ;;  %s719_s1 = inlined_call_operand.vmem [shape: f32[2,1,16], index: 1, kind: input, shape index: {}]   ;;  %s720_s2 = inlined_call_operand.vmem [shape: f32[32,16], index: 2, kind: input, shape index: {}]   ;;  %s721_s3 = inlined_call_operand.vmem [shape: f32[32,1], index: 3, kind: input, shape index: {}]   ;;  %s722_s4 = inlined_call_operand.vmem [shape: f32[32,1], index: 4, kind: input, shape index: {}]   ;;  %s723_s5 = inlined_call_operand.vmem [shape: f32[2,32,256], index: 5, kind: output, shape index: {}]  }
   0x1   :  { %s645_s20 = smov 0  }
   0x2 LB: > { %s27_s21 = sadd.s32 1, %s604_s19  ;;  %p540_p0 = scmp.ge.s32.totalorder %s608_s20, 1  ;;  %s608_s20 = sphi %s645_s20, %s15_s20   ;;  %s604_s19 = sphi %s643_s19, %s725_s19   ;;  %s600_s18 = sphi %s641_s18, %s724_s18  }
   0x3   : > { %p29_p1 = scmp.ge.s32.totalorder %s27_s21, 2  ;;  %p216_p2 = scmp.lt.s32.totalorder %s608_s20, 3 }
   0x5   : > { %s727_s21 = smov (%p29_p1, %s27_s21), 0  ;;  %p217_p3 = pnand %p540_p0, %p216_p2 }
   0x6   : > { %p256_p4 = scmp.lt.s32.totalorder (!%p217_p3), %s600_s18, 1  ;;  %v610_v0 = vmov (!%p217_p3), 0   ;;  %v370_v1 = vld [vmem:[%s721_s3 + $0x10] sm:$0xff] (!%p217_p3)  ;;  %v368_v2 = vld [vmem:[%s721_s3] sm:$0xff] (!%p217_p3)  ;;  %v280_v4 = vld [vmem:[%s720_s2 + $0x8] sm:$0xff] (!%p217_p3)  ;;  %vm308_vm0 = vcmask (!%p217_p3), 130048  }
   0x7   : > { %220 = sbr.rel (%p217_p3) target bundleno = 242 (0xf2), region = 40  ;;  %347 = vmatprep.mubr.bf16.mxu0 (!%p217_p3), %v610_v0  ;;  %357 = vmatprep.mubr.bf16.mxu1 (!%p217_p3), %v610_v0  ;;  %v279_v3 = vld [vmem:[%s720_s2] sm:$0xff] (!%p217_p3)  ;;  %v281_v5 = vld [vmem:[%s720_s2 + $0x10] sm:$0xff] (!%p217_p3)  ;;  %v282_v6 = vld [vmem:[%s720_s2 + $0x18] sm:$0xff] (!%p217_p3) }
   0x8   : > { %582 = vset.pattern.permute.xlu1 (!%p217_p3), %v610_v0  ;;  %581 = vset.pattern.permute.xlu0 (!%p217_p3), %v610_v0  ;;  %v371_v7 = vld [vmem:[%s721_s3 + $0x18] sm:$0xff] (!%p217_p3)  ;;  %v369_v8 = vld [vmem:[%s721_s3 + $0x8] sm:$0xff] (!%p217_p3)  ;;  %v400_v19 = vld [vmem:[%s722_s4] sm:$0xff] (!%p217_p3) }
   0x9   : > { %384 = vperm.xlu1 (!%p217_p3), %582, %v370_v1   ;;  %374 = vperm.xlu0 (!%p217_p3), %581, %v368_v2   ;;  %v401_v18 = vld [vmem:[%s722_s4 + $0x8] sm:$0xff] (!%p217_p3)  ;;  %v403_v20 = vld [vmem:[%s722_s4 + $0x18] sm:$0xff] (!%p217_p3)  ;;  %v402_v21 = vld [vmem:[%s722_s4 + $0x10] sm:$0xff] (!%p217_p3) }
   0xd   : > { %389 = vperm.xlu1 (!%p217_p3), %582, %v371_v7   ;;  %379 = vperm.xlu0 (!%p217_p3), %581, %v369_v8  }
   0xe   : > { %s729_s18 = smov (!%p256_p4, %s600_s18), 1 }
   0xf   : > { %s552_s9 = sshll.u32 %s729_s18, 4  ;;  %s267_s12 = scalar_lea.vmem %s719_s1, %s729_s18 }
  0x10   : > { %s263_s23 = scalar_lea.vmem %s718_s0, %s552_s9  ;;  %v545_v9 = vld [vmem:[%s267_s12] ss:$0 sm:$0xff]  ;;  %s553_s7 = sshll.u32 %s729_s18, 6 }
  0x11   : > { %v583_v10 = vld [vmem:[%s263_s23 + $0x4] ss:$8 sps:$4 sm:$0xff]   ;;  %v290_v11 = vmul.f32 %v545_v9, %v279_v3  ;;  %v291_v12 = vmul.f32 %v545_v9, %v280_v4  ;;  %v292_v13 = vmul.f32 %v545_v9, %v281_v5  ;;  %v293_v14 = vmul.f32 %v545_v9, %v282_v6  ;;  %v585_v15 = vld [vmem:[%s263_s23] ss:$8 sps:$4 sm:$0xff]   ;;  %411 = vperm.xlu1 %582, %v401_v18   ;;  %s276_s10 = scalar_lea.vmem %s723_s5, %s553_s7 }
  0x12   : > { %315 = vmatprep.subr.bf16.mxu0 %v583_v10  ;;  %554 = vmatprep.subr.bf16.mxu1 %v583_v10 }
  0x13   : > { %v294_v16 = vpack.c.bf16 %v291_v12, %v290_v11  ;;  %v295_v17 = vpack.c.bf16 %v293_v14, %v292_v13  ;;  %316 = vmatpush1.bf16.msra.mxu0 %v585_v15  ;;  %555 = vmatpush1.bf16.msra.mxu1 %v585_v15 }
  0x14   : > { %406 = vperm.xlu0 %581, %v400_v19  }
  0x15   : > { %421 = vperm.xlu1 %582, %v403_v20  }
  0x16   : > { %548 = vmatmul.mubr.msk.bf16.vlgmr.msra.gmra.mrb[0].mxu0 %vm308_vm0, %v294_v16  ;;  %549 = vmatmul.mubr.msk.bf16.vlgmr.msra.gmra.mrb[0].mxu1 %vm308_vm0, %v295_v17 }
  0x18   : > { %416 = vperm.xlu0 %581, %v402_v21  }
  0x88   : > { %v375_v22 = vpop.permute.xlu0 %374  ;;  %v385_v23 = vpop.permute.xlu1 %384 }
  0x8c   : > { %v380_v24 = vpop.permute.xlu0 %379  ;;  %v390_v25 = vpop.permute.xlu1 %389 }
  0x90   : > { %v412_v27 = vpop.permute.xlu1 %411 }
  0x93   : > { %v407_v26 = vpop.permute.xlu0 %406 }
  0x94   : > { %v422_v45 = vpop.permute.xlu1 %421 }
  0x97   : > { %v417_v28 = vpop.permute.xlu0 %416 }
  0xe9   : > { %v349_v29 = vpop.f32.mrb[0].mxu0  ;;  %v359_v30 = vpop.f32.mrb[0].mxu1 }
  0xea   : > { %v392_v31 = vmul.f32 %v375_v22, %v349_v29  ;;  %v396_v32 = vmul.f32 %v385_v23, %v359_v30  ;;  %v351_v33 = vpop.f32.mrb[1].mxu0  ;;  %v361_v34 = vpop.f32.mrb[1].mxu1 }
  0xeb   : > { %v393_v35 = vmul.f32 %v375_v22, %v351_v33  ;;  %v397_v36 = vmul.f32 %v385_v23, %v361_v34  ;;  %v353_v37 = vpop.f32.mrb[2].mxu0  ;;  %v363_v38 = vpop.f32.mrb[2].mxu1 }
  0xec   : > { %v424_v39 = vadd.f32 %v407_v26, %v392_v31  ;;  %v428_v40 = vadd.f32 %v417_v28, %v396_v32  ;;  %v394_v41 = vmul.f32 %v380_v24, %v353_v37  ;;  %v398_v42 = vmul.f32 %v390_v25, %v363_v38  ;;  %v355_v43 = vpop.f32.mrb[3].mxu0  ;;  %v365_v44 = vpop.f32.mrb[3].mxu1 }
  0xed   : > { %v425_v46 = vadd.f32 %v407_v26, %v393_v35  ;;  %v429_v47 = vadd.f32 %v417_v28, %v397_v36  ;;  %v395_v48 = vmul.f32 %v380_v24, %v355_v43  ;;  %v399_v49 = vmul.f32 %v390_v25, %v365_v44 }
  0xee   : > { %432 = vst [vmem:[%s276_s10] sm:$0xff] %v424_v39  ;;  %436 = vst [vmem:[%s276_s10 + $0x20] sm:$0xff] %v428_v40  ;;  %v426_v50 = vadd.f32 %v412_v27, %v394_v41  ;;  %v430_v51 = vadd.f32 %v422_v45, %v398_v42 }
  0xef   : > { %433 = vst [vmem:[%s276_s10 + $0x8] sm:$0xff] %v425_v46  ;;  %437 = vst [vmem:[%s276_s10 + $0x28] sm:$0xff] %v429_v47  ;;  %v427_v52 = vadd.f32 %v412_v27, %v395_v48  ;;  %v431_v53 = vadd.f32 %v422_v45, %v399_v49 }
  0xf0   : > { %434 = vst [vmem:[%s276_s10 + $0x10] sm:$0xff] %v426_v50  ;;  %438 = vst [vmem:[%s276_s10 + $0x30] sm:$0xff] %v430_v51 }
  0xf1   : > { %435 = vst [vmem:[%s276_s10 + $0x18] sm:$0xff] %v427_v52  ;;  %439 = vst [vmem:[%s276_s10 + $0x38] sm:$0xff] %v431_v53 }
  0xf2 PF: > { %s15_s20 = sadd.s32 1, %s608_s20   ;;  %s724_s18 = smov %s604_s19 }
  0xf3   : > { %p12_p5 = scmp.ge.s32.totalorder %s15_s20, 4   ;;  %s725_s19 = smov %s727_s21 }
  0xf5   :  { %14 = sbr.rel (!%p12_p5) target bundleno = 2 (0x2), region = 73 }

// kernel: dep_se_sep_forward.2
= control target key start
LH: loop header
LB: loop body
LE: loop exit
PB: predicated region body
PF: predicated region fallthrough
CT: control target
= control target key end

     0   :  { %s2330_s30 = smov 0   ;;  %s2332_s10 = smov 0   ;;  %s3323_s0 = inlined_call_operand.vmem [shape: bf16[4,10,18,16], index: 0, kind: input, shape index: {}]   ;;  %s3324_s1 = inlined_call_operand.vmem [shape: f32[9,16], index: 1, kind: input, shape index: {}]   ;;  %s3325_s2 = inlined_call_operand.vmem [shape: f32[1,16], index: 2, kind: input, shape index: {}]   ;;  %s3326_s3 = inlined_call_operand.vmem [shape: f32[1,16], index: 3, kind: input, shape index: {}]   ;;  %s3327_s4 = inlined_call_operand.vmem [shape: f32[16,4], index: 4, kind: input, shape index: {}]   ;;  %s3328_s5 = inlined_call_operand.vmem [shape: f32[1,4], index: 5, kind: input, shape index: {}]   ;;  %s3329_s6 = inlined_call_operand.vmem [shape: f32[4,16], index: 6, kind: input, shape index: {}]   ;;  %s3330_s7 = inlined_call_operand.vmem [shape: f32[1,16], index: 7, kind: input, shape index: {}]   ;;  %s3331_s8 = inlined_call_operand.vmem [shape: bf16[2,16,256], index: 8, kind: output, shape index: {0}]   ;;  %s3332_s9 = inlined_call_operand.vmem [shape: f32[2,1,16], index: 9, kind: output, shape index: {1}]  }
   0x1   :  { %s2334_s11 = smov 0   ;;  %s2336_s12 = smov 0  }
   0x2   :  { %s2338_s13 = smov 0   ;;  %s2340_s14 = smov 0  }
   0x3   :  { %s2342_s15 = smov 0  }
   0x4 LB: > { %s29_s16 = sadd.s32 1, %s2266_s13  ;;  %s32_s17 = sadd.s32 1, %s2270_s14  ;;  %s2274_s15 = sphi %s2342_s15, %s20_s15   ;;  %s2270_s14 = sphi %s2340_s14, %s3345_s14   ;;  %s2266_s13 = sphi %s2338_s13, %s3344_s13   ;;  %s2262_s12 = sphi %s2336_s12, %s3343_s12   ;;  %s2258_s11 = sphi %s2334_s11, %s3342_s11   ;;  %s2254_s10 = sphi %s2332_s10, %s3341_s10   ;;  %s2250_s30 = sphi %s2330_s30, %s3340_s30  }
   0x5   : > { %p30_p0 = scmp.ge.s32.totalorder %s29_s16, 2  ;;  %s1945_s18 = sadd.s32 4294967295, %s2274_s15  }
   0x6   : > { %p228_p1 = scmp.ne.s32.totalorder %s2254_s10, %s2250_s30  ;;  %p229_p2 = scmp.eq.s32.totalorder %s1945_s18, 3 }
   0x7   : > { %s3347_s16 = smov (%p30_p0, %s29_s16), 0  ;;  %s3349_s17 = smov (!%p30_p0, %s32_s17), %s2270_s14 }
   0x8   : > { %3335 = sst [smem:[#allocation4_spill]] %s3347_s16  ;;  %s214_s19 = ssub.s32 %s2266_s13, %s3347_s16 }
   0x9   : > { %p34_p3 = scmp.ge.s32.totalorder %s3349_s17, 2  ;;  %p1951_p4 = scmp.ge.s32.totalorder %s2274_s15, 1 }
   0xa   : > { %p2376_p5 = por %p229_p2, %p228_p1  ;;  %p312_p6 = scmp.lt.s32.totalorder %s2274_s15, 5 }
   0xb   : > { %s3351_s17 = smov (%p34_p3, %s3349_s17), 0  ;;  %s218_s23 = sadd.s32 1, %s2254_s10 }
   0xc   : > { %3337 = sst [smem:[#allocation5_spill]] %s3351_s17  ;;  %p313_p7 = pnand %p1951_p4, %p312_p6 }
   0xd   : > { %s213_s21 = ssub.s32 %s2270_s14, %s3351_s17  ;;  %s344_s25 = sand.u32 (!%p313_p7), 1, %s2250_s30  }
   0xe   : > { %s215_s22 = sor.u32 %s214_s19, %s213_s21  ;;  %316 = sbr.rel (%p313_p7) target bundleno = 757 (0x2f5), region = 52 }
   0xf   : > { %p216_p8 = scmp.eq.s32.totalorder %s215_s22, 0  ;;  %s1953_s26 = sshll.u32 (!%p313_p7), %s2262_s12, 1 }
  0x10   : > { %s1952_s27 = sshll.u32 (!%p313_p7), %s344_s25, 3  ;;  %s353_s28 = sadd.s32 (!%p313_p7), %s2258_s11, %s1953_s26 }
  0x11   : > { %s2387_s24 = scalar_select %p216_p8, %s2254_s10, %s218_s23  }
  0x12   : > { %p354_p9 = scmp.lt.s32.totalorder (!%p313_p7), %s353_s28, 3  ;;  %p361_p10 = scmp.lt.s32.totalorder (!%p313_p7), %s2262_s12, 1 }
  0x13   : > { %s2405_s30 = scalar_lea.vmem (!%p313_p7), [#allocation3], %s1952_s27  ;;  %p1955_p11 = scmp.ne.s32.totalorder (!%p313_p7), %s2258_s11, 0 }
  0x15   : > { %s3353_s28 = smov (!%p354_p9, %s353_s28), 3  ;;  %367 = sbr.rel (%p1955_p11) target bundleno = 28 (0x1c), region = 56 }
  0x16   : > { %s2394_s29 = scalar_select %p361_p10, %s2262_s12, 1 }
  0x17   : > { %s2120_s18 = smul.u32 120, %s3353_s28  ;;  %vm368_vm0 = vcmask (!%p1955_p11), 122880   ;;  %v2276_v0 = vmov (!%p1955_p11), 0.0  }
  0x18   : > { %s363_s22 = scalar_lea.vmem %s3332_s9, %s2394_s29  ;;  %369 = vst.msk [vmem:[#allocation2] sm:$0x1] (!%p1955_p11), %vm368_vm0, %v2276_v0 }
  0x19   : > { %s2403_s16 = scalar_lea.vmem %s3323_s0, %s2120_s18 }
  0x1c PF: > { %v2037_v1 = vld [vmem:[%s2403_s16] sm:$0xff]   ;;  %v404_v2 = vlaneseq  ;;  %vm508_vm1 = vcmask 1046528   ;;  %v1956_v6 = vld [vmem:[%s2403_s16 + $0xc] sm:$0xff]   ;;  %vm649_vm2 = vcmask 1045504   ;;  %v2096_v12 = vld [vmem:[%s2403_s16 + $0x18] sm:$0xff]   ;;  %vm1547_vm3 = vcmask 130048  }
  0x1d   : > { %v2038_v3 = vunpack.c.l.bf16 %v2037_v1  ;;  %v2409_v4 = vunpack.c.h.bf16 %v2037_v1  ;;  %v581_v5 = vld [vmem:[%s2403_s16] sm:$0xe]  ;;  %v1980_v7 = vld [vmem:[%s2403_s16 + $0xc] sm:$0xe]  ;;  %v739_v10 = vunpack.c.l.bf16 %v1956_v6  ;;  %v2414_v11 = vunpack.c.h.bf16 %v1956_v6  ;;  %v2012_v13 = vld [vmem:[%s2403_s16 + $0x18] sm:$0xe] }
  0x1e   : > { %v405_v8 = vshrl.u32 %v404_v2, 7  ;;  %v589_v9 = vunpack.c.l.bf16 %v581_v5  ;;  %v370_v14 = vld [vmem:[%s3324_s1] sm:$0xff]  ;;  %v939_v15 = vunpack.c.l.bf16 %v1980_v7  ;;  %v2421_v16 = vunpack.c.l.bf16 %v2096_v12  ;;  %v2456_v47 = vld [vmem:[%s3324_s1 + $0x8] ss:$0 sm:$0xff]  ;;  %v1972_v1 = vld [vmem:[%s2403_s16 + $0x14] sm:$0x1] }
  0x1f   : > { %v2423_v17 = vunpack.c.h.bf16 %v2096_v12  ;;  %v1288_v18 = vunpack.c.l.bf16 %v2012_v13  ;;  %v440_v56 = vld [vmem:[%s2403_s16 + $0x8] sm:$0x1]  ;;  %v2004_v7 = vld [vmem:[%s2403_s16 + $0x20] sm:$0x1]  ;;  %vm1586_vm4 = vcmask 122880   ;;  %p2025_p12 = scmp.ne.s32.totalorder %s2258_s11, 1 }
  0x20   : > { %v406_v19 = vsub.s32 0, %v405_v8  ;;  %v458_v20 = vsub.s32 1, %v405_v8  ;;  %v599_v21 = vsub.s32 2, %v405_v8  ;;  %v757_v22 = vsub.s32 3, %v405_v8 }
  0x21   : > { %v809_v23 = vsub.s32 4, %v405_v8  ;;  %v949_v24 = vsub.s32 5, %v405_v8  ;;  %v1106_v25 = vsub.s32 6, %v405_v8  ;;  %v1158_v26 = vsub.s32 7, %v405_v8 }
  0x22   : > { %v2425_v27 = vrot.slane %v370_v14, %v406_v19  ;;  %v2427_v28 = vrot.slane %v370_v14, %v458_v20  ;;  %v2429_v29 = vrot.slane %v370_v14, %v599_v21  ;;  %v2431_v30 = vrot.slane %v370_v14, %v757_v22  ;;  %v374_v19 = vld [vmem:[%s2403_s16 + $0xc] sm:$0xff]  }
  0x23   : > { %v2433_v31 = vrot.slane %v370_v14, %v809_v23  ;;  %v2435_v32 = vrot.slane %v370_v14, %v949_v24  ;;  %v2437_v33 = vrot.slane %v370_v14, %v1106_v25  ;;  %v2439_v34 = vrot.slane %v370_v14, %v1158_v26 }
  0x24   : > { %v408_v35 = vmul.f32 %v2038_v3, %v2425_v27  ;;  %v460_v36 = vmul.f32 %v2038_v3, %v2427_v28  ;;  %v461_v37 = vmul.f32 %v2409_v4, %v2427_v28  ;;  %v601_v38 = vmul.f32 %v2429_v29, %v589_v9 }
  0x25   : > { %v602_v39 = vmul.f32 %v2409_v4, %v2429_v29  ;;  %v759_v40 = vmul.f32 %v2431_v30, %v739_v10  ;;  %v811_v41 = vmul.f32 %v2433_v31, %v739_v10  ;;  %v812_v42 = vmul.f32 %v2433_v31, %v2414_v11 }
  0x26   : > { %v509_v43 = vrot.slane %v460_v36, 1  ;;  %v510_v44 = vrot.slane %v461_v37, 1  ;;  %v650_v45 = vrot.slane %v601_v38, 2  ;;  %v951_v46 = vmul.f32 %v2435_v32, %v939_v15 }
  0x27   : > { %v651_v48 = vrot.slane %v602_v39, 2  ;;  %v859_v49 = vrot.slane %v811_v41, 1  ;;  %v860_v50 = vrot.slane %v812_v42, 1  ;;  %v952_v51 = vmul.f32 %v2435_v32, %v2414_v11 }
  0x28   : > { %v511_v52 = vsel %vm508_vm1, %v509_v43, %v510_v44  ;;  %v999_v53 = vrot.slane %v951_v46, 2  ;;  %v1108_v54 = vmul.f32 %v2421_v16, %v2437_v33  ;;  %v1160_v55 = vmul.f32 %v2421_v16, %v2439_v34 }
  0x29   : > { %v565_v57 = vadd.f32 %v511_v52, %v408_v35  ;;  %v652_v58 = vsel %vm649_vm2, %v650_v45, %v651_v48  ;;  %v861_v59 = vsel %vm508_vm1, %v859_v49, %v860_v50  ;;  %v1000_v60 = vrot.slane %v952_v51, 2  ;;  %v582_v49 = vld [vmem:[%s2403_s16 + $0xc] sm:$0xe] }
  0x2a   : > { %v1161_v61 = vmul.f32 %v2423_v17, %v2439_v34  ;;  %v1208_v62 = vrot.slane %v1160_v55, 1  ;;  %v1300_v63 = vmul.f32 %v2456_v47, %v1288_v18  ;;  %v1301_v0 = vmul.f32 %v2423_v17, %v2456_v47 }
  0x2b   : > { %v706_v2 = vadd.f32 %v652_v58, %v565_v57  ;;  %v1001_v3 = vsel %vm649_vm2, %v999_v53, %v1000_v60  ;;  %v409_v5 = vmul.f32 %v2409_v4, %v2425_v27  ;;  %v448_v6 = vunpack.c.l.bf16 %v440_v56 }
  0x2c   : > { %v1209_v8 = vrot.slane %v1161_v61, 1  ;;  %v1348_v9 = vrot.slane %v1300_v63, 2  ;;  %v1349_v10 = vrot.slane %v1301_v0, 2  ;;  %v760_v12 = vmul.f32 %v2431_v30, %v2414_v11  ;;  %v2509_v61 = vld [vmem:[%s3325_s2] ss:$0 sm:$0xff] }
  0x2d   : > { %v775_v13 = vadd.f32 %v759_v40, %v706_v2  ;;  %v462_v14 = vmul.f32 %v2427_v28, %v448_v6  ;;  %v603_v15 = vmul.f32 %v2429_v29, %v448_v6  ;;  %v799_v18 = vunpack.c.l.bf16 %v1972_v1  ;;  %v1981_v1 = vld [vmem:[%s2403_s16 + $0x18] sm:$0xe] }
  0x2e   : > { %v1210_v20 = vsel %vm508_vm1, %v1208_v62, %v1209_v8  ;;  %v1350_v21 = vsel %vm649_vm2, %v1348_v9, %v1349_v10  ;;  %v1109_v4 = vmul.f32 %v2423_v17, %v2437_v33  ;;  %v1148_v22 = vunpack.c.l.bf16 %v2004_v7  ;;  %v2525_v7 = vld [vmem:[%s3326_s3] ss:$0 sm:$0xff] }
  0x2f   : > { %v915_v23 = vadd.f32 %v861_v59, %v775_v13  ;;  %v512_v24 = vrot.slane %v462_v14, 1  ;;  %v653_v25 = vrot.slane %v603_v15, 2  ;;  %v813_v11 = vmul.f32 %v2433_v31, %v799_v18  ;;  %v1990_v13 = vld [vmem:[%s2403_s16 + $0x24] sm:$0xff]  }
  0x30   : > { %v953_v26 = vmul.f32 %v2435_v32, %v799_v18  ;;  %v1162_v35 = vmul.f32 %v2439_v34, %v1148_v22  ;;  %v1302_v36 = vmul.f32 %v2456_v47, %v1148_v22  ;;  %v390_v37 = vunpack.c.l.bf16 %v374_v19 }
  0x31   : > { %v1055_v38 = vadd.f32 %v1001_v3, %v915_v23  ;;  %v513_v39 = vsel %vm508_vm1, %v510_v44, %v512_v24  ;;  %v654_v40 = vsel %vm649_vm2, %v651_v48, %v653_v25  ;;  %v862_v41 = vrot.slane %v813_v11, 1 }
  0x32   : > { %v566_v42 = vadd.f32 %v513_v39, %v409_v5  ;;  %v1002_v43 = vrot.slane %v953_v26, 2  ;;  %v1211_v45 = vrot.slane %v1162_v35, 1  ;;  %v1351_v46 = vrot.slane %v1302_v36, 2  ;;  %v2013_v35 = vld [vmem:[%s2403_s16 + $0x24] sm:$0xe] }
  0x33   : > { %v1124_v51 = vadd.f32 %v1108_v54, %v1055_v38  ;;  %v863_v52 = vsel %vm508_vm1, %v860_v50, %v862_v41  ;;  %v2495_v53 = vunpack.c.h.bf16 %v374_v19  ;;  %v410_v55 = vmul.f32 %v2425_v27, %v390_v37 }
  0x34   : > { %v707_v56 = vadd.f32 %v654_v40, %v566_v42  ;;  %v1003_v57 = vsel %vm649_vm2, %v1000_v60, %v1002_v43  ;;  %v1212_v44 = vsel %vm508_vm1, %v1209_v8, %v1211_v45  ;;  %v1352_v48 = vsel %vm649_vm2, %v1349_v10, %v1351_v46 }
  0x35   : > { %v1264_v58 = vadd.f32 %v1210_v20, %v1124_v51  ;;  %v463_v59 = vmul.f32 %v2427_v28, %v390_v37  ;;  %v2504_v54 = vmul.f32 %v2427_v28, %v2495_v53  ;;  %v590_v50 = vunpack.c.l.bf16 %v582_v49 }
  0x36   : > { %v776_v62 = vadd.f32 %v760_v12, %v707_v56  ;;  %v2513_v60 = vmul.f32 %v2429_v29, %v2495_v53  ;;  %v761_v63 = vmul.f32 %v2421_v16, %v2431_v30  ;;  %v814_v0 = vmul.f32 %v2421_v16, %v2433_v31 }
  0x37   : > { %v1404_v2 = vadd.f32 %v1350_v21, %v1264_v58  ;;  %v514_v3 = vrot.slane %v463_v59, 1  ;;  %v515_v5 = vrot.slane %v2504_v54, 1  ;;  %v604_v6 = vmul.f32 %v2429_v29, %v590_v50 }
  0x38   : > { %v916_v8 = vadd.f32 %v863_v52, %v776_v62  ;;  %v656_v9 = vrot.slane %v2513_v60, 2  ;;  %v2530_v10 = vmul.f32 %v2423_v17, %v2433_v31  ;;  %v864_v12 = vrot.slane %v814_v0, 1  ;;  %v1973_v62 = vld [vmem:[%s2403_s16 + $0x20] sm:$0x1] }
  0x39   : > { %v1427_v14 = vmul.f32 %v2509_v61, %v1404_v2  ;;  %v516_v15 = vsel %vm508_vm1, %v514_v3, %v515_v5  ;;  %v655_v18 = vrot.slane %v604_v6, 2  ;;  %v940_v19 = vunpack.c.l.bf16 %v1981_v1 }
  0x3a   : > { %v1056_v20 = vadd.f32 %v1003_v57, %v916_v8  ;;  %v567_v21 = vadd.f32 %v516_v15, %v410_v55  ;;  %v865_v22 = vrot.slane %v2530_v10, 1  ;;  %v2540_v23 = vmul.f32 %v2423_v17, %v2435_v32  ;;  %v2005_v15 = vld [vmem:[%s2403_s16 + $0x2c] sm:$0x1] }
  0x3b   : > { %v2543_v24 = vadd.f32 %v2525_v7, %v1427_v14  ;;  %v657_v25 = vsel %vm649_vm2, %v655_v18, %v656_v9  ;;  %v954_v11 = vmul.f32 %v2435_v32, %v940_v19  ;;  %v1090_v26 = vunpack.c.l.bf16 %v1990_v13 }
  0x3c   : > { %v1125_v36 = vadd.f32 %v1109_v4, %v1056_v20  ;;  %v708_v37 = vadd.f32 %v657_v25, %v567_v21  ;;  %v866_v38 = vsel %vm508_vm1, %v864_v12, %v865_v22  ;;  %v1005_v39 = vrot.slane %v2540_v23, 2  ;;  %v441_v4 = vld [vmem:[%s2403_s16 + $0x14] sm:$0x1] }
  0x3d   : > { %v1466_v40 = vmul.f32 0.5, %v2543_v24  ;;  %v1004_v41 = vrot.slane %v954_v11, 2  ;;  %v1091_v42 = vunpack.c.h.bf16 %v1990_v13  ;;  %v1110_v43 = vmul.f32 %v2437_v33, %v1090_v26 }
  0x3e   : > { %v1265_v45 = vadd.f32 %v1212_v44, %v1125_v36  ;;  %v777_v46 = vadd.f32 %v761_v63, %v708_v37  ;;  %v1163_v49 = vmul.f32 %v2439_v34, %v1090_v26  ;;  %v1289_v51 = vunpack.c.l.bf16 %v2013_v35 }
  0x3f   : > { %2181 = vtanh.f32 %v1466_v40  ;;  %v1006_v52 = vsel %vm649_vm2, %v1004_v41, %v1005_v39  ;;  %v1164_v55 = vmul.f32 %v2439_v34, %v1091_v42  ;;  %v1304_v56 = vmul.f32 %v2456_v47, %v1091_v42 }
  0x40   : > { %v1405_v57 = vadd.f32 %v1352_v48, %v1265_v45  ;;  %v917_v58 = vadd.f32 %v866_v38, %v777_v46  ;;  %v1213_v59 = vrot.slane %v1163_v49, 1  ;;  %v1303_v50 = vmul.f32 %v2456_v47, %v1289_v51  ;;  %v583_v49 = vld [vmem:[%s2403_s16 + $0x18] sm:$0xe] }
  0x41   : > { %v1214_v44 = vrot.slane %v1164_v55, 1  ;;  %v1354_v63 = vrot.slane %v1304_v56, 2  ;;  %v411_v0 = vmul.f32 %v2425_v27, %v2495_v53  ;;  %v449_v1 = vunpack.c.l.bf16 %v441_v4 }
  0x42   : > { %v1428_v2 = vmul.f32 %v2509_v61, %v1405_v57  ;;  %v1057_v3 = vadd.f32 %v1006_v52, %v917_v58  ;;  %v1353_v6 = vrot.slane %v1303_v50, 2  ;;  %v762_v8 = vmul.f32 %v2423_v17, %v2431_v30 }
  0x43   : > { %v1215_v48 = vsel %vm508_vm1, %v1213_v59, %v1214_v44  ;;  %v465_v12 = vmul.f32 %v2427_v28, %v449_v1  ;;  %v606_v13 = vmul.f32 %v2429_v29, %v449_v1  ;;  %v800_v14 = vunpack.c.l.bf16 %v1973_v62 }
  0x44   : > { %v2573_v18 = vadd.f32 %v2525_v7, %v1428_v2  ;;  %v1126_v53 = vadd.f32 %v1110_v43, %v1057_v3  ;;  %v1355_v19 = vsel %vm649_vm2, %v1353_v6, %v1354_v63  ;;  %v1111_v20 = vmul.f32 %v2437_v33, %v1091_v42 }
  0x45   : > { %v517_v21 = vrot.slane %v465_v12, 1  ;;  %v658_v23 = vrot.slane %v606_v13, 2  ;;  %v816_v25 = vmul.f32 %v2433_v31, %v800_v14  ;;  %v956_v11 = vmul.f32 %v2435_v32, %v800_v14 }
  0x46   : > { %v1467_v26 = vmul.f32 0.5, %v2573_v18  ;;  %v1266_v35 = vadd.f32 %v1215_v48, %v1126_v53  ;;  %v1149_v36 = vunpack.c.l.bf16 %v2005_v15  ;;  %v412_v37 = vmul.f32 %v2421_v16, %v2425_v27  ;;  %v1982_v15 = vld [vmem:[%s2403_s16 + $0x24] sm:$0xe] }
  0x47   : > { %v518_v38 = vsel %vm508_vm1, %v515_v5, %v517_v21  ;;  %v659_v40 = vsel %vm649_vm2, %v656_v9, %v658_v23  ;;  %v867_v41 = vrot.slane %v816_v25, 1  ;;  %v1007_v42 = vrot.slane %v956_v11, 2 }
  0x48   : > { %2183 = vtanh.f32 %v1467_v26  ;;  %v1406_v43 = vadd.f32 %v1355_v19, %v1266_v35  ;;  %v568_v45 = vadd.f32 %v518_v38, %v411_v0  ;;  %v1165_v46 = vmul.f32 %v2439_v34, %v1149_v36 }
  0x49   : > { %v2182_v51 = vpop.eup %2181  ;;  %v868_v54 = vsel %vm508_vm1, %v865_v22, %v867_v41  ;;  %v1008_v5 = vsel %vm649_vm2, %v1005_v39, %v1007_v42  ;;  %v1305_v60 = vmul.f32 %v2456_v47, %v1149_v36  ;;  %v466_v9 = vmul.f32 %v2421_v16, %v2427_v28  ;;  %v1960_v22 = vld [vmem:[%s2403_s16 + $0x24] sm:$0xff]  }
  0x4a   : > { %v1498_v4 = vmul.f32 0.5, %v2182_v51  ;;  %v1429_v52 = vmul.f32 %v2509_v61, %v1406_v43  ;;  %v709_v55 = vadd.f32 %v659_v40, %v568_v45  ;;  %v1216_v56 = vrot.slane %v1165_v46, 1 }
  0x4b   : > { %v1356_v57 = vrot.slane %v1305_v60, 2  ;;  %v2600_v58 = vmul.f32 %v2423_v17, %v2427_v28  ;;  %v519_v10 = vrot.slane %v466_v9, 1  ;;  %v591_v59 = vunpack.c.l.bf16 %v583_v49 }
  0x4c   : > { %v1514_v50 = vadd.f32 0.5, %v1498_v4  ;;  %v2604_v39 = vadd.f32 %v2525_v7, %v1429_v52  ;;  %v778_v62 = vadd.f32 %v762_v8, %v709_v55  ;;  %v1217_v16 = vsel %vm508_vm1, %v1214_v44, %v1216_v56 }
  0x4d   : > { %v1357_v0 = vsel %vm649_vm2, %v1354_v63, %v1356_v57  ;;  %v520_v1 = vrot.slane %v2600_v58, 1  ;;  %v607_v2 = vmul.f32 %v2429_v29, %v591_v59  ;;  %v2612_v3 = vmul.f32 %v2423_v17, %v2429_v29 }
  0x4e   : > { %v1530_v6 = vmul.f32 %v1514_v50, %v2543_v24  ;;  %v1468_v48 = vmul.f32 0.5, %v2604_v39  ;;  %v918_v12 = vadd.f32 %v868_v54, %v778_v62  ;;  %v743_v13 = vunpack.c.l.bf16 %v1960_v22  ;;  %v2097_v24 = vld [vmem:[%s2403_s16 + $0x30] sm:$0xff]   ;;  %v442_v62 = vld [vmem:[%s2403_s16 + $0x20] sm:$0x1] }
  0x4f   : > { %v521_v44 = vsel %vm508_vm1, %v519_v10, %v520_v1  ;;  %v660_v63 = vrot.slane %v607_v2, 2  ;;  %v661_v8 = vrot.slane %v2612_v3, 2  ;;  %v744_v14 = vunpack.c.h.bf16 %v1960_v22 }
  0x50   : > { %v1548_v53 = vsel %vm1547_vm3, %v1530_v6, 0.0  ;;  %1588 = vxpose.xlu0.b32.start [1/16] (narrow) %v1530_v6, 16  ;;  %2185 = vtanh.f32 %v1468_v48  ;;  %v1058_v19 = vadd.f32 %v1008_v5, %v918_v12  ;;  %v569_v21 = vadd.f32 %v521_v44, %v412_v37  ;;  %v2014_v5 = vld [vmem:[%s2403_s16 + $0x30] sm:$0xe] }
  0x51   : > { %v662_v23 = vsel %vm649_vm2, %v660_v63, %v661_v8  ;;  %v763_v25 = vmul.f32 %v2431_v30, %v743_v13  ;;  %v817_v11 = vmul.f32 %v2433_v31, %v743_v13  ;;  %v2629_v26 = vmul.f32 %v2433_v31, %v744_v14 }
  0x52   : > { %v2184_v35 = vpop.eup %2183  ;;  %v1127_v36 = vadd.f32 %v1111_v20, %v1058_v19  ;;  %v710_v38 = vadd.f32 %v662_v23, %v569_v21  ;;  %v941_v40 = vunpack.c.l.bf16 %v1982_v15  ;;  %v2632_v41 = vmul.f32 %v2435_v32, %v744_v14 }
  0x53   : > { %v1499_v37 = vmul.f32 0.5, %v2184_v35  ;;  %v869_v42 = vrot.slane %v817_v11, 1  ;;  %v870_v43 = vrot.slane %v2629_v26, 1  ;;  %v2635_v45 = vunpack.c.l.bf16 %v2097_v24 }
  0x54   : > { %v1267_v46 = vadd.f32 %v1217_v16, %v1127_v36  ;;  %v779_v49 = vadd.f32 %v763_v25, %v710_v38  ;;  %v957_v51 = vmul.f32 %v2435_v32, %v941_v40  ;;  %v1010_v54 = vrot.slane %v2632_v41, 2 }
  0x55   : > { %v1515_v20 = vadd.f32 0.5, %v1499_v37  ;;  %v871_v60 = vsel %vm508_vm1, %v869_v42, %v870_v43  ;;  %v2643_v9 = vunpack.c.h.bf16 %v2097_v24  ;;  %v1112_v4 = vmul.f32 %v2635_v45, %v2437_v33  ;;  %v1974_v24 = vld [vmem:[%s2403_s16 + $0x2c] sm:$0x1] }
  0x56   : > { %v1407_v52 = vadd.f32 %v1357_v0, %v1267_v46  ;;  %v919_v55 = vadd.f32 %v871_v60, %v779_v49  ;;  %v1009_v56 = vrot.slane %v957_v51, 2  ;;  %v1166_v57 = vmul.f32 %v2635_v45, %v2439_v34  ;;  %v2006_v49 = vld [vmem:[%s2403_s16 + $0x38] sm:$0x1]  ;;  %v378_v51 = vld [vmem:[%s2403_s16 + $0x24] sm:$0xff]  }
  0x57   : > { %v1531_v10 = vmul.f32 %v1515_v20, %v2573_v18  ;;  %v2652_v59 = vmul.f32 %v2643_v9, %v2439_v34  ;;  %v1290_v22 = vunpack.c.l.bf16 %v2014_v5  ;;  %v2656_v50 = vmul.f32 %v2643_v9, %v2456_v47 }
  0x58   : > { %v1430_v16 = vmul.f32 %v2509_v61, %v1407_v52  ;;  %v1011_v0 = vsel %vm649_vm2, %v1009_v56, %v1010_v54  ;;  %v1218_v2 = vrot.slane %v1166_v57, 1  ;;  %v413_v18 = vmul.f32 %v2423_v17, %v2425_v27 }
  0x59   : > { %v1549_v6 = vsel %vm1547_vm3, %v1531_v10, 0.0  ;;  %1589 = vxpose.xlu0.b32.cont [2/16] (narrow) %v1531_v10, 16  ;;  %v1059_v48 = vadd.f32 %v1011_v0, %v919_v55  ;;  %v1219_v12 = vrot.slane %v2652_v59, 1  ;;  %v1306_v13 = vmul.f32 %v2456_v47, %v1290_v22 }
  0x5a   : > { %v2186_v44 = vpop.eup %2185  ;;  %v1550_v63 = vadd.f32 %v1549_v6, %v1548_v53  ;;  %v2669_v15 = vadd.f32 %v2525_v7, %v1430_v16  ;;  %v1359_v19 = vrot.slane %v2656_v50, 2  ;;  %v450_v21 = vunpack.c.l.bf16 %v442_v62 }
  0x5b   : > { %v1500_v17 = vmul.f32 0.5, %v2186_v44  ;;  %v1128_v23 = vadd.f32 %v1112_v4, %v1059_v48  ;;  %v1220_v25 = vsel %vm508_vm1, %v1218_v2, %v1219_v12  ;;  %v1358_v11 = vrot.slane %v1306_v13, 2  ;;  %v584_v48 = vld [vmem:[%s2403_s16 + $0x24] sm:$0xe] }
  0x5c   : > { %v1469_v35 = vmul.f32 0.5, %v2669_v15  ;;  %v468_v36 = vmul.f32 %v2427_v28, %v450_v21  ;;  %v609_v53 = vmul.f32 %v2429_v29, %v450_v21  ;;  %v764_v38 = vmul.f32 %v2431_v30, %v744_v14 }
  0x5d   : > { %v1516_v40 = vadd.f32 0.5, %v1500_v17  ;;  %v1268_v37 = vadd.f32 %v1220_v25, %v1128_v23  ;;  %v1360_v42 = vsel %vm649_vm2, %v1358_v11, %v1359_v19  ;;  %v801_v46 = vunpack.c.l.bf16 %v1974_v24 }
  0x5e   : > { %2187 = vtanh.f32 %v1469_v35  ;;  %v522_v5 = vrot.slane %v468_v36, 1  ;;  %v663_v20 = vrot.slane %v609_v53, 2  ;;  %v1113_v60 = vmul.f32 %v2643_v9, %v2437_v33  ;;  %v1983_v36 = vld [vmem:[%s2403_s16 + $0x30] sm:$0xe] }
  0x5f   : > { %v1532_v4 = vmul.f32 %v1516_v40, %v2604_v39  ;;  %v1408_v52 = vadd.f32 %v1360_v42, %v1268_v37  ;;  %v819_v55 = vmul.f32 %v2433_v31, %v801_v46  ;;  %v959_v14 = vmul.f32 %v2435_v32, %v801_v46 }
  0x60   : > { %v523_v56 = vsel %vm508_vm1, %v520_v1, %v522_v5  ;;  %v664_v57 = vsel %vm649_vm2, %v661_v8, %v663_v20  ;;  %v1150_v10 = vunpack.c.l.bf16 %v2006_v49  ;;  %v394_v59 = vunpack.c.l.bf16 %v378_v51 }
  0x61   : > { %v1551_v22 = vsel %vm1547_vm3, %v1532_v4, 0.0  ;;  %1590 = vxpose.xlu0.b32.cont [3/16] (narrow) %v1532_v4, 16  ;;  %v1431_v39 = vmul.f32 %v2509_v61, %v1408_v52  ;;  %v570_v50 = vadd.f32 %v523_v56, %v413_v18  ;;  %v872_v62 = vrot.slane %v819_v55, 1 }
  0x62   : > { %v2694_v16 = vadd.f32 %v1551_v22, %v1550_v63  ;;  %v1012_v0 = vrot.slane %v959_v14, 2  ;;  %v1168_v58 = vmul.f32 %v2439_v34, %v1150_v10  ;;  %v1308_v1 = vmul.f32 %v2456_v47, %v1150_v10 }
  0x63   : > { %v2699_v3 = vadd.f32 %v2525_v7, %v1431_v39  ;;  %v711_v8 = vadd.f32 %v664_v57, %v570_v50  ;;  %v873_v2 = vsel %vm508_vm1, %v870_v43, %v872_v62  ;;  %v2704_v6 = vunpack.c.h.bf16 %v378_v51  ;;  %v1994_v51 = vld [vmem:[%s2403_s16 + $0x3c] sm:$0xff]  }
  0x64   : > { %v1013_v18 = vsel %vm649_vm2, %v1010_v54, %v1012_v0  ;;  %v1221_v13 = vrot.slane %v1168_v58, 1  ;;  %v1361_v44 = vrot.slane %v1308_v1, 2  ;;  %v414_v63 = vmul.f32 %v2425_v27, %v394_v59  ;;  %v2015_v58 = vld [vmem:[%s2403_s16 + $0x3c] sm:$0xe] }
  0x65   : > { %v1470_v21 = vmul.f32 0.5, %v2699_v3  ;;  %v780_v24 = vadd.f32 %v764_v38, %v711_v8  ;;  %v469_v17 = vmul.f32 %v2427_v28, %v394_v59  ;;  %v2715_v26 = vmul.f32 %v2427_v28, %v2704_v6 }
  0x66   : > { %v1222_v43 = vsel %vm508_vm1, %v1219_v12, %v1221_v13  ;;  %v1362_v41 = vsel %vm649_vm2, %v1359_v19, %v1361_v44  ;;  %v592_v23 = vunpack.c.l.bf16 %v584_v48  ;;  %v2721_v54 = vmul.f32 %v2429_v29, %v2704_v6 }
  0x67   : > { %2189 = vtanh.f32 %v1470_v21  ;;  %v920_v25 = vadd.f32 %v873_v2, %v780_v24  ;;  %v524_v11 = vrot.slane %v469_v17, 1  ;;  %v525_v35 = vrot.slane %v2715_v26, 1 }
  0x68   : > { %v2188_v53 = vpop.eup %2187  ;;  %v610_v38 = vmul.f32 %v2429_v29, %v592_v23  ;;  %v666_v40 = vrot.slane %v2721_v54, 2  ;;  %v765_v12 = vmul.f32 %v2635_v45, %v2431_v30  ;;  %v820_v19 = vmul.f32 %v2635_v45, %v2433_v31 }
  0x69   : > { %v1501_v37 = vmul.f32 0.5, %v2188_v53  ;;  %v1060_v42 = vadd.f32 %v1013_v18, %v920_v25  ;;  %v526_v46 = vsel %vm508_vm1, %v524_v11, %v525_v35  ;;  %v2736_v49 = vmul.f32 %v2643_v9, %v2433_v31 }
  0x6a   : > { %v571_v5 = vadd.f32 %v526_v46, %v414_v63  ;;  %v665_v20 = vrot.slane %v610_v38, 2  ;;  %v874_v4 = vrot.slane %v820_v19, 1  ;;  %v942_v52 = vunpack.c.l.bf16 %v1983_v36  ;;  %v443_v63 = vld [vmem:[%s2403_s16 + $0x2c] sm:$0x1]  ;;  %v1975_v19 = vld [vmem:[%s2403_s16 + $0x38] sm:$0x1] }
  0x6b   : > { %v1517_v55 = vadd.f32 0.5, %v1501_v37  ;;  %v1129_v14 = vadd.f32 %v1113_v60, %v1060_v42  ;;  %v875_v56 = vrot.slane %v2736_v49, 1  ;;  %v2742_v57 = vmul.f32 %v2643_v9, %v2435_v32 }
  0x6c   : > { %v667_v10 = vsel %vm649_vm2, %v665_v20, %v666_v40  ;;  %v960_v59 = vmul.f32 %v2435_v32, %v942_v52  ;;  %v1094_v22 = vunpack.c.l.bf16 %v1994_v51  ;;  %v1095_v39 = vunpack.c.h.bf16 %v1994_v51 }
  0x6d   : > { %v1533_v50 = vmul.f32 %v1517_v55, %v2669_v15  ;;  %v1269_v62 = vadd.f32 %v1222_v43, %v1129_v14  ;;  %v712_v0 = vadd.f32 %v667_v10, %v571_v5  ;;  %v876_v60 = vsel %vm508_vm1, %v874_v4, %v875_v56 }
  0x6e   : > { %v1014_v1 = vrot.slane %v960_v59, 2  ;;  %v1015_v8 = vrot.slane %v2742_v57, 2  ;;  %v1114_v2 = vmul.f32 %v2437_v33, %v1094_v22  ;;  %v1169_v48 = vmul.f32 %v2439_v34, %v1094_v22 }
  0x6f   : > { %v1553_v18 = vsel %vm1547_vm3, %v1533_v50, 0.0  ;;  %1591 = vxpose.xlu0.b32.cont [4/16] (narrow) %v1533_v50, 16  ;;  %v1409_v13 = vadd.f32 %v1362_v41, %v1269_v62  ;;  %v781_v44 = vadd.f32 %v765_v12, %v712_v0  ;;  %v2758_v15 = vmul.f32 %v2439_v34, %v1095_v39 }
  0x70   : > { %v1554_v21 = vadd.f32 %v1553_v18, %v2694_v16  ;;  %v1016_v24 = vsel %vm649_vm2, %v1014_v1, %v1015_v8  ;;  %v1223_v17 = vrot.slane %v1169_v48, 1  ;;  %v1291_v43 = vunpack.c.l.bf16 %v2015_v58  ;;  %v2007_v1 = vld [vmem:[%s2403_s16 + $0x44] sm:$0x1] }
  0x71   : > { %v2190_v23 = vpop.eup %2189  ;;  %v1432_v25 = vmul.f32 %v2509_v61, %v1409_v13  ;;  %v921_v11 = vadd.f32 %v876_v60, %v781_v44  ;;  %v1224_v41 = vrot.slane %v2758_v15, 1  ;;  %v2768_v36 = vmul.f32 %v2456_v47, %v1095_v39 }
  0x72   : > { %v1502_v53 = vmul.f32 0.5, %v2190_v23  ;;  %v1309_v38 = vmul.f32 %v2456_v47, %v1291_v43  ;;  %v415_v16 = vmul.f32 %v2425_v27, %v2704_v6  ;;  %v451_v12 = vunpack.c.l.bf16 %v443_v63 }
  0x73   : > { %v2775_v37 = vadd.f32 %v2525_v7, %v1432_v25  ;;  %v1061_v42 = vadd.f32 %v1016_v24, %v921_v11  ;;  %v1225_v46 = vsel %vm508_vm1, %v1223_v17, %v1224_v41  ;;  %v1364_v51 = vrot.slane %v2768_v36, 2 }
  0x74   : > { %v1518_v5 = vadd.f32 0.5, %v1502_v53  ;;  %v1363_v20 = vrot.slane %v1309_v38, 2  ;;  %v471_v4 = vmul.f32 %v2427_v28, %v451_v12  ;;  %v612_v52 = vmul.f32 %v2429_v29, %v451_v12 }
  0x75   : > { %v1471_v6 = vmul.f32 0.5, %v2775_v37  ;;  %v1130_v55 = vadd.f32 %v1114_v2, %v1061_v42  ;;  %v766_v14 = vmul.f32 %v2643_v9, %v2431_v30  ;;  %v802_v10 = vunpack.c.l.bf16 %v1975_v19 }
  0x76   : > { %v1534_v59 = vmul.f32 %v1518_v5, %v2699_v3  ;;  %v1365_v22 = vsel %vm649_vm2, %v1363_v20, %v1364_v51  ;;  %v527_v50 = vrot.slane %v471_v4, 1  ;;  %v668_v62 = vrot.slane %v612_v52, 2  ;;  %v1984_v4 = vld [vmem:[%s2403_s16 + $0x3c] sm:$0xe] }
  0x77   : > { %2191 = vtanh.f32 %v1471_v6  ;;  %v1270_v0 = vadd.f32 %v1225_v46, %v1130_v55  ;;  %v822_v60 = vmul.f32 %v2433_v31, %v802_v10  ;;  %v962_v58 = vmul.f32 %v2435_v32, %v802_v10 }
  0x78   : > { %v1555_v2 = vsel %vm1547_vm3, %v1534_v59, 0.0  ;;  %1592 = vxpose.xlu0.b32.cont [5/16] (narrow) %v1534_v59, 16  ;;  %v528_v48 = vsel %vm508_vm1, %v525_v35, %v527_v50  ;;  %v669_v3 = vsel %vm649_vm2, %v666_v40, %v668_v62  ;;  %v1115_v18 = vmul.f32 %v2437_v33, %v1095_v39  ;;  %v585_v35 = vld [vmem:[%s2403_s16 + $0x30] sm:$0xe] }
  0x79   : > { %v2799_v13 = vadd.f32 %v1555_v2, %v1554_v21  ;;  %v1410_v44 = vadd.f32 %v1365_v22, %v1270_v0  ;;  %v572_v63 = vadd.f32 %v528_v48, %v415_v16  ;;  %v877_v24 = vrot.slane %v822_v60, 1  ;;  %v1964_v21 = vld [vmem:[%s2403_s16 + $0x3c] sm:$0xff]  }
  0x7a   : > { %v1017_v17 = vrot.slane %v962_v58, 2  ;;  %v1151_v43 = vunpack.c.l.bf16 %v2007_v1  ;;  %v416_v23 = vmul.f32 %v2635_v45, %v2425_v27  ;;  %v472_v26 = vmul.f32 %v2635_v45, %v2427_v28  ;;  %v2098_v1 = vld [vmem:[%s2403_s16 + $0x48] sm:$0xff]  }
  0x7b   : > { %v1433_v54 = vmul.f32 %v2509_v61, %v1410_v44  ;;  %v713_v25 = vadd.f32 %v669_v3, %v572_v63  ;;  %v878_v40 = vsel %vm508_vm1, %v875_v56, %v877_v24  ;;  %v2812_v39 = vmul.f32 %v2643_v9, %v2427_v28 }
  0x7c   : > { %v1018_v11 = vsel %vm649_vm2, %v1015_v8, %v1017_v17  ;;  %v1171_v45 = vmul.f32 %v2439_v34, %v1151_v43  ;;  %v1311_v36 = vmul.f32 %v2456_v47, %v1151_v43  ;;  %v529_v53 = vrot.slane %v472_v26, 1 }
  0x7d   : > { %v2821_v38 = vadd.f32 %v2525_v7, %v1433_v54  ;;  %v782_v49 = vadd.f32 %v766_v14, %v713_v25  ;;  %v530_v56 = vrot.slane %v2812_v39, 1  ;;  %v593_v16 = vunpack.c.l.bf16 %v585_v35  ;;  %v2016_v25 = vld [vmem:[%s2403_s16 + $0x48] sm:$0xe] }
  0x7e   : > { %v1226_v12 = vrot.slane %v1171_v45, 1  ;;  %v1366_v19 = vrot.slane %v1311_v36, 2  ;;  %v2826_v57 = vmul.f32 %v2643_v9, %v2429_v29  ;;  %v747_v8 = vunpack.c.l.bf16 %v1964_v21 }
  0x7f   : > { %v1472_v42 = vmul.f32 0.5, %v2821_v38  ;;  %v922_v46 = vadd.f32 %v878_v40, %v782_v49  ;;  %v531_v5 = vsel %vm508_vm1, %v529_v53, %v530_v56  ;;  %v613_v20 = vmul.f32 %v2429_v29, %v593_v16  ;;  %v444_v16 = vld [vmem:[%s2403_s16 + $0x38] sm:$0x1] }
  0x80   : > { %v1227_v52 = vsel %vm508_vm1, %v1224_v41, %v1226_v12  ;;  %v1367_v6 = vsel %vm649_vm2, %v1364_v51, %v1366_v19  ;;  %v573_v55 = vadd.f32 %v531_v5, %v416_v23  ;;  %v671_v14 = vrot.slane %v2826_v57, 2 }
  0x81   : > { %v2192_v10 = vpop.eup %2191  ;;  %2193 = vtanh.f32 %v1472_v42  ;;  %v1062_v59 = vadd.f32 %v1018_v11, %v922_v46  ;;  %v670_v22 = vrot.slane %v613_v20, 2  ;;  %v748_v50 = vunpack.c.h.bf16 %v1964_v21 }
  0x82   : > { %v1503_v62 = vmul.f32 0.5, %v2192_v10  ;;  %v767_v0 = vmul.f32 %v2431_v30, %v747_v8  ;;  %v823_v60 = vmul.f32 %v2433_v31, %v747_v8  ;;  %v943_v58 = vunpack.c.l.bf16 %v1984_v4 }
  0x83   : > { %v1131_v15 = vadd.f32 %v1115_v18, %v1062_v59  ;;  %v672_v41 = vsel %vm649_vm2, %v670_v22, %v671_v14  ;;  %v2846_v51 = vmul.f32 %v2433_v31, %v748_v50  ;;  %v2849_v2 = vmul.f32 %v2435_v32, %v748_v50  ;;  %v1976_v59 = vld [vmem:[%s2403_s16 + $0x44] sm:$0x1] }
  0x84   : > { %v1519_v48 = vadd.f32 0.5, %v1503_v62  ;;  %v714_v3 = vadd.f32 %v672_v41, %v573_v55  ;;  %v879_v44 = vrot.slane %v823_v60, 1  ;;  %v963_v63 = vmul.f32 %v2435_v32, %v943_v58 }
  0x85   : > { %v1271_v24 = vadd.f32 %v1227_v52, %v1131_v15  ;;  %v880_v17 = vrot.slane %v2846_v51, 1  ;;  %v1020_v18 = vrot.slane %v2849_v2, 2  ;;  %v2854_v43 = vunpack.c.l.bf16 %v2098_v1 }
  0x86   : > { %v1535_v23 = vmul.f32 %v1519_v48, %v2775_v37  ;;  %v783_v26 = vadd.f32 %v767_v0, %v714_v3  ;;  %v1019_v35 = vrot.slane %v963_v63, 2  ;;  %v2857_v54 = vunpack.c.h.bf16 %v2098_v1  ;;  %v382_v63 = vld [vmem:[%s2403_s16 + $0x3c] sm:$0xff]  }
  0x87   : > { %v1411_v40 = vadd.f32 %v1367_v6, %v1271_v24  ;;  %v881_v21 = vsel %vm508_vm1, %v879_v44, %v880_v17  ;;  %v1116_v11 = vmul.f32 %v2854_v43, %v2437_v33  ;;  %v1172_v45 = vmul.f32 %v2854_v43, %v2439_v34 }
  0x88   : > { %v1557_v36 = vsel %vm1547_vm3, %v1535_v23, 0.0  ;;  %1593 = vxpose.xlu0.b32.cont [6/16] (narrow) %v1535_v23, 16  ;;  %v923_v37 = vadd.f32 %v881_v21, %v783_v26  ;;  %v1021_v53 = vsel %vm649_vm2, %v1019_v35, %v1020_v18  ;;  %v2873_v49 = vmul.f32 %v2857_v54, %v2439_v34 }
  0x89   : > { %v1558_v12 = vadd.f32 %v1557_v36, %v2799_v13  ;;  %v1434_v19 = vmul.f32 %v2509_v61, %v1411_v40  ;;  %v1228_v8 = vrot.slane %v1172_v45, 1  ;;  %v1292_v42 = vunpack.c.l.bf16 %v2016_v25 }
  0x8a   : > { %v1063_v46 = vadd.f32 %v1021_v53, %v923_v37  ;;  %v1229_v5 = vrot.slane %v2873_v49, 1  ;;  %v1313_v20 = vmul.f32 %v2857_v54, %v2456_v47  ;;  %v417_v4 = vmul.f32 %v2643_v9, %v2425_v27 }
  0x8b   : > { %v2194_v52 = vpop.eup %2193  ;;  %v2884_v6 = vadd.f32 %v2525_v7, %v1434_v19  ;;  %v1312_v55 = vmul.f32 %v2456_v47, %v1292_v42  ;;  %v452_v13 = vunpack.c.l.bf16 %v444_v16  ;;  %v768_v10 = vmul.f32 %v2431_v30, %v748_v50  ;;  %v2008_v50 = vld [vmem:[%s2403_s16 + $0x50] sm:$0x1] }
  0x8c   : > { %v1504_v22 = vmul.f32 0.5, %v2194_v52  ;;  %v1132_v62 = vadd.f32 %v1116_v11, %v1063_v46  ;;  %v1230_v0 = vsel %vm508_vm1, %v1228_v8, %v1229_v5  ;;  %v1369_v60 = vrot.slane %v1313_v20, 2  ;;  %v586_v20 = vld [vmem:[%s2403_s16 + $0x3c] sm:$0xe] }
  0x8d   : > { %v1473_v58 = vmul.f32 0.5, %v2884_v6  ;;  %v1368_v9 = vrot.slane %v1312_v55, 2  ;;  %v474_v1 = vmul.f32 %v2427_v28, %v452_v13  ;;  %v615_v15 = vmul.f32 %v2429_v29, %v452_v13 }
  0x8e   : > { %v1520_v41 = vadd.f32 0.5, %v1504_v22  ;;  %v1272_v48 = vadd.f32 %v1230_v0, %v1132_v62  ;;  %v803_v3 = vunpack.c.l.bf16 %v1976_v59  ;;  %v1117_v44 = vmul.f32 %v2857_v54, %v2437_v33 }
  0x8f   : > { %2195 = vtanh.f32 %v1473_v58  ;;  %v1370_v24 = vsel %vm649_vm2, %v1368_v9, %v1369_v60  ;;  %v532_v23 = vrot.slane %v474_v1, 1  ;;  %v673_v26 = vrot.slane %v615_v15, 2  ;;  %v1985_v58 = vld [vmem:[%s2403_s16 + $0x48] sm:$0xe] }
  0x90   : > { %v1536_v35 = vmul.f32 %v1520_v41, %v2821_v38  ;;  %v1412_v25 = vadd.f32 %v1370_v24, %v1272_v48  ;;  %v825_v40 = vmul.f32 %v2433_v31, %v803_v3  ;;  %v965_v21 = vmul.f32 %v2435_v32, %v803_v3 }
  0x91   : > { %v533_v11 = vsel %vm508_vm1, %v530_v56, %v532_v23  ;;  %v674_v45 = vsel %vm649_vm2, %v671_v14, %v673_v26  ;;  %v1152_v36 = vunpack.c.l.bf16 %v2008_v50  ;;  %v398_v37 = vunpack.c.l.bf16 %v382_v63 }
  0x92   : > { %v1559_v53 = vsel %vm1547_vm3, %v1536_v35, 0.0  ;;  %1594 = vxpose.xlu0.b32.cont [7/16] (narrow) %v1536_v35, 16  ;;  %v1435_v38 = vmul.f32 %v2509_v61, %v1412_v25  ;;  %v574_v49 = vadd.f32 %v533_v11, %v417_v4  ;;  %v882_v16 = vrot.slane %v825_v40, 1 }
  0x93   : > { %v2909_v19 = vadd.f32 %v1559_v53, %v1558_v12  ;;  %v1022_v8 = vrot.slane %v965_v21, 2  ;;  %v1174_v39 = vmul.f32 %v2439_v34, %v1152_v36  ;;  %v1314_v56 = vmul.f32 %v2456_v47, %v1152_v36 }
  0x94   : > { %v2914_v57 = vadd.f32 %v2525_v7, %v1435_v38  ;;  %v715_v14 = vadd.f32 %v674_v45, %v574_v49  ;;  %v883_v42 = vsel %vm508_vm1, %v880_v17, %v882_v16  ;;  %v2919_v46 = vunpack.c.h.bf16 %v382_v63  ;;  %v1998_v63 = vld [vmem:[%s2403_s16 + $0x54] sm:$0xff]  }
  0x95   : > { %v1023_v12 = vsel %vm649_vm2, %v1020_v18, %v1022_v8  ;;  %v1231_v4 = vrot.slane %v1174_v39, 1  ;;  %v1371_v52 = vrot.slane %v1314_v56, 2  ;;  %v418_v47 = vmul.f32 %v2425_v27, %v398_v37  ;;  %v2017_v8 = vld [vmem:[%s2403_s16 + $0x54] sm:$0xe] }
  0x96   : > { %v1474_v55 = vmul.f32 0.5, %v2914_v57  ;;  %v784_v13 = vadd.f32 %v768_v10, %v715_v14  ;;  %v475_v59 = vmul.f32 %v2427_v28, %v398_v37  ;;  %v2930_v51 = vmul.f32 %v2427_v28, %v2919_v46 }
  0x97   : > { %v1232_v17 = vsel %vm508_vm1, %v1229_v5, %v1231_v4  ;;  %v1372_v2 = vsel %vm649_vm2, %v1369_v60, %v1371_v52  ;;  %v594_v22 = vunpack.c.l.bf16 %v586_v20  ;;  %v2936_v18 = vmul.f32 %v2429_v29, %v2919_v46  ;;  %v445_v52 = vld [vmem:[%s2403_s16 + $0x44] sm:$0x1] }
  0x98   : > { %2197 = vtanh.f32 %v1474_v55  ;;  %v924_v62 = vadd.f32 %v883_v42, %v784_v13  ;;  %v534_v0 = vrot.slane %v475_v59, 1  ;;  %v535_v10 = vrot.slane %v2930_v51, 1 }
  0x99   : > { %v2196_v9 = vpop.eup %2195  ;;  %v616_v1 = vmul.f32 %v2429_v29, %v594_v22  ;;  %v676_v15 = vrot.slane %v2936_v18, 2  ;;  %v769_v5 = vmul.f32 %v2854_v43, %v2431_v30  ;;  %v826_v60 = vmul.f32 %v2854_v43, %v2433_v31  ;;  %v3029_v18 = vld [vmem:[%s3325_s2] ss:$0 sm:$0xff] }
  0x9a   : > { %v1505_v41 = vmul.f32 0.5, %v2196_v9  ;;  %v1064_v48 = vadd.f32 %v1023_v12, %v924_v62  ;;  %v536_v3 = vsel %vm508_vm1, %v534_v0, %v535_v10  ;;  %v2951_v50 = vmul.f32 %v2857_v54, %v2433_v31  ;;  %v2985_v0 = vld [vmem:[%s3324_s1 + $0x8] ss:$0 sm:$0xff] }
  0x9b   : > { %v575_v24 = vadd.f32 %v536_v3, %v418_v47  ;;  %v675_v23 = vrot.slane %v616_v1, 2  ;;  %v884_v26 = vrot.slane %v826_v60, 1  ;;  %v944_v35 = vunpack.c.l.bf16 %v1985_v58  ;;  %v1977_v60 = vld [vmem:[%s2403_s16 + $0x50] sm:$0x1] }
  0x9c   : > { %v1521_v25 = vadd.f32 0.5, %v1505_v41  ;;  %v1133_v40 = vadd.f32 %v1117_v44, %v1064_v48  ;;  %v885_v21 = vrot.slane %v2951_v50, 1  ;;  %v2957_v11 = vmul.f32 %v2857_v54, %v2435_v32  ;;  %v3048_v50 = vld [vmem:[%s3326_s3] ss:$0 sm:$0xff] }
  0x9d   : > { %v677_v45 = vsel %vm649_vm2, %v675_v23, %v676_v15  ;;  %v966_v36 = vmul.f32 %v2435_v32, %v944_v35  ;;  %v1098_v37 = vunpack.c.l.bf16 %v1998_v63  ;;  %v1099_v53 = vunpack.c.h.bf16 %v1998_v63 }
  0x9e   : > { %v1537_v38 = vmul.f32 %v1521_v25, %v2884_v6  ;;  %v1273_v49 = vadd.f32 %v1232_v17, %v1133_v40  ;;  %v716_v16 = vadd.f32 %v677_v45, %v575_v24  ;;  %v886_v44 = vsel %vm508_vm1, %v884_v26, %v885_v21 }
  0x9f   : > { %v1024_v39 = vrot.slane %v966_v36, 2  ;;  %v1025_v56 = vrot.slane %v2957_v11, 2  ;;  %v1118_v14 = vmul.f32 %v2437_v33, %v1098_v37  ;;  %v1175_v42 = vmul.f32 %v2439_v34, %v1098_v37 }
  0xa0   : > { %v1561_v20 = vsel %vm1547_vm3, %v1537_v38, 0.0  ;;  %1595 = vxpose.xlu0.b32.cont [8/16] (narrow) %v1537_v38, 16  ;;  %v1413_v12 = vadd.f32 %v1372_v2, %v1273_v49  ;;  %v785_v4 = vadd.f32 %v769_v5, %v716_v16  ;;  %v2973_v6 = vmul.f32 %v2439_v34, %v1099_v53 }
  0xa1   : > { %v1562_v47 = vadd.f32 %v1561_v20, %v2909_v19  ;;  %v1026_v55 = vsel %vm649_vm2, %v1024_v39, %v1025_v56  ;;  %v1233_v13 = vrot.slane %v1175_v42, 1  ;;  %v1293_v59 = vunpack.c.l.bf16 %v2017_v8 }
  0xa2   : > { %v2198_v17 = vpop.eup %2197  ;;  %v1436_v22 = vmul.f32 %v2509_v61, %v1413_v12  ;;  %v925_v62 = vadd.f32 %v886_v44, %v785_v4  ;;  %v1234_v2 = vrot.slane %v2973_v6, 1  ;;  %v2988_v58 = vmul.f32 %v2985_v0, %v1099_v53  ;;  %v2009_v44 = vld [vmem:[%s2403_s16 + $0x5c] sm:$0x1]  ;;  %v2099_v6 = vld [vmem:[%s2403_s16 + $0x60] sm:$0xff]  }
  0xa3   : > { %v1506_v19 = vmul.f32 0.5, %v2198_v17  ;;  %v1315_v9 = vmul.f32 %v2985_v0, %v1293_v59  ;;  %v419_v1 = vmul.f32 %v2425_v27, %v2919_v46  ;;  %v453_v5 = vunpack.c.l.bf16 %v445_v52  ;;  %v1968_v17 = vld [vmem:[%s2403_s16 + $0x54] sm:$0xff]  }
  0xa4   : > { %v2995_v61 = vadd.f32 %v2525_v7, %v1436_v22  ;;  %v1065_v41 = vadd.f32 %v1026_v55, %v925_v62  ;;  %v1235_v48 = vsel %vm508_vm1, %v1233_v13, %v1234_v2  ;;  %v1374_v3 = vrot.slane %v2988_v58, 2 }
  0xa5   : > { %v1522_v63 = vadd.f32 0.5, %v1506_v19  ;;  %v1373_v24 = vrot.slane %v1315_v9, 2  ;;  %v477_v23 = vmul.f32 %v2427_v28, %v453_v5  ;;  %v618_v26 = vmul.f32 %v2429_v29, %v453_v5 }
  0xa6   : > { %v1475_v46 = vmul.f32 0.5, %v2995_v61  ;;  %v1134_v35 = vadd.f32 %v1118_v14, %v1065_v41  ;;  %v770_v7 = vmul.f32 %v2857_v54, %v2431_v30  ;;  %v804_v25 = vunpack.c.l.bf16 %v1977_v60 }
  0xa7   : > { %v1538_v40 = vmul.f32 %v1522_v63, %v2914_v57  ;;  %v1375_v45 = vsel %vm649_vm2, %v1373_v24, %v1374_v3  ;;  %v537_v36 = vrot.slane %v477_v23, 1  ;;  %v678_v37 = vrot.slane %v618_v26, 2  ;;  %v1986_v23 = vld [vmem:[%s2403_s16 + $0x54] sm:$0xe] }
  0xa8   : > { %2199 = vtanh.f32 %v1475_v46  ;;  %v1274_v38 = vadd.f32 %v1235_v48, %v1134_v35  ;;  %v828_v49 = vmul.f32 %v2433_v31, %v804_v25  ;;  %v968_v16 = vmul.f32 %v2435_v32, %v804_v25 }
  0xa9   : > { %v1563_v8 = vsel %vm1547_vm3, %v1538_v40, 0.0  ;;  %1596 = vxpose.xlu0.b32.cont [9/16] (narrow) %v1538_v40, 16  ;;  %v538_v39 = vsel %vm508_vm1, %v535_v10, %v537_v36  ;;  %v679_v57 = vsel %vm649_vm2, %v676_v15, %v678_v37  ;;  %v1119_v14 = vmul.f32 %v2437_v33, %v1099_v53  ;;  %v587_v10 = vld [vmem:[%s2403_s16 + $0x48] sm:$0xe] }
  0xaa   : > { %v3019_v42 = vadd.f32 %v1563_v8, %v1562_v47  ;;  %v1414_v20 = vadd.f32 %v1375_v45, %v1274_v38  ;;  %v576_v12 = vadd.f32 %v538_v39, %v419_v1  ;;  %v887_v4 = vrot.slane %v828_v49, 1 }
  0xab   : > { %v1027_v52 = vrot.slane %v968_v16, 2  ;;  %v1153_v55 = vunpack.c.l.bf16 %v2009_v44  ;;  %v420_v13 = vmul.f32 %v2854_v43, %v2425_v27  ;;  %v478_v51 = vmul.f32 %v2854_v43, %v2427_v28 }
  0xac   : > { %v1437_v15 = vmul.f32 %v3029_v18, %v1414_v20  ;;  %v717_v53 = vadd.f32 %v679_v57, %v576_v12  ;;  %v888_v47 = vsel %vm508_vm1, %v885_v21, %v887_v4  ;;  %v3037_v59 = vmul.f32 %v2857_v54, %v2427_v28 }
  0xad   : > { %v1028_v43 = vsel %vm649_vm2, %v1025_v56, %v1027_v52  ;;  %v1177_v22 = vmul.f32 %v2439_v34, %v1153_v55  ;;  %v1317_v62 = vmul.f32 %v2985_v0, %v1153_v55  ;;  %v539_v58 = vrot.slane %v478_v51, 1 }
  0xae   : > { %v3051_v21 = vadd.f32 %v3048_v50, %v1437_v15  ;;  %v786_v19 = vadd.f32 %v770_v7, %v717_v53  ;;  %v540_v9 = vrot.slane %v3037_v59, 1  ;;  %v595_v11 = vunpack.c.l.bf16 %v587_v10  ;;  %v2018_v53 = vld [vmem:[%s2403_s16 + $0x60] sm:$0xe] }
  0xaf   : > { %v1236_v1 = vrot.slane %v1177_v22, 1  ;;  %v1376_v56 = vrot.slane %v1317_v62, 2  ;;  %v3056_v5 = vmul.f32 %v2857_v54, %v2429_v29  ;;  %v751_v60 = vunpack.c.l.bf16 %v1968_v17 }
  0xb0   : > { %v1476_v41 = vmul.f32 0.5, %v3051_v21  ;;  %v926_v48 = vadd.f32 %v888_v47, %v786_v19  ;;  %v541_v63 = vsel %vm508_vm1, %v539_v58, %v540_v9  ;;  %v619_v24 = vmul.f32 %v2429_v29, %v595_v11  ;;  %v446_v19 = vld [vmem:[%s2403_s16 + $0x50] sm:$0x1] }
  0xb1   : > { %v1237_v26 = vsel %vm508_vm1, %v1234_v2, %v1236_v1  ;;  %v1377_v46 = vsel %vm649_vm2, %v1374_v3, %v1376_v56  ;;  %v577_v35 = vadd.f32 %v541_v63, %v420_v13  ;;  %v681_v7 = vrot.slane %v3056_v5, 2 }
  0xb2   : > { %v2200_v25 = vpop.eup %2199  ;;  %2201 = vtanh.f32 %v1476_v41  ;;  %v1066_v40 = vadd.f32 %v1028_v43, %v926_v48  ;;  %v680_v45 = vrot.slane %v619_v24, 2  ;;  %v3069_v36 = vunpack.c.h.bf16 %v1968_v17 }
  0xb3   : > { %v1507_v37 = vmul.f32 0.5, %v2200_v25  ;;  %v771_v38 = vmul.f32 %v2431_v30, %v751_v60  ;;  %v829_v49 = vmul.f32 %v2433_v31, %v751_v60  ;;  %v945_v16 = vunpack.c.l.bf16 %v1986_v23 }
  0xb4   : > { %v1135_v44 = vadd.f32 %v1119_v14, %v1066_v40  ;;  %v682_v2 = vsel %vm649_vm2, %v680_v45, %v681_v7  ;;  %v3079_v3 = vmul.f32 %v2433_v31, %v3069_v36  ;;  %v3083_v8 = vmul.f32 %v2435_v32, %v3069_v36 }
  0xb5   : > { %v1523_v39 = vadd.f32 0.5, %v1507_v37  ;;  %v718_v57 = vadd.f32 %v682_v2, %v577_v35  ;;  %v889_v20 = vrot.slane %v829_v49, 1  ;;  %v969_v12 = vmul.f32 %v2435_v32, %v945_v16 }
  0xb6   : > { %v1275_v4 = vadd.f32 %v1237_v26, %v1135_v44  ;;  %v890_v14 = vrot.slane %v3079_v3, 1  ;;  %v1030_v52 = vrot.slane %v3083_v8, 2  ;;  %v3088_v55 = vunpack.c.l.bf16 %v2099_v6 }
  0xb7   : > { %v3091_v13 = vmul.f32 %v1523_v39, %v2995_v61  ;;  %v787_v51 = vadd.f32 %v771_v38, %v718_v57  ;;  %v1029_v10 = vrot.slane %v969_v12, 2  ;;  %v3093_v15 = vunpack.c.h.bf16 %v2099_v6  ;;  %v2010_v57 = vld [vmem:[%s2403_s16 + $0x68] sm:$0x1] }
  0xb8   : > { %v1415_v47 = vadd.f32 %v1377_v46, %v1275_v4  ;;  %v891_v17 = vsel %vm508_vm1, %v889_v20, %v890_v14  ;;  %v1178_v43 = vmul.f32 %v3088_v55, %v2439_v34  ;;  %v1120_v62 = vmul.f32 %v3088_v55, %v2437_v33  ;;  %v1978_v46 = vld [vmem:[%s2403_s16 + $0x5c] sm:$0x1] }
  0xb9   : > { %1597 = vxpose.xlu0.b32.cont [10/16] (narrow) %v3091_v13, 16  ;;  %v927_v22 = vadd.f32 %v891_v17, %v787_v51  ;;  %v1031_v61 = vsel %vm649_vm2, %v1029_v10, %v1030_v52  ;;  %v3109_v58 = vmul.f32 %v3093_v15, %v2439_v34  ;;  %v1294_v56 = vunpack.c.l.bf16 %v2018_v53  ;;  %v386_v51 = vld [vmem:[%s2403_s16 + $0x54] sm:$0xff]  }
  0xba   : > { %v1438_v11 = vmul.f32 %v3029_v18, %v1415_v47  ;;  %v1238_v1 = vrot.slane %v1178_v43, 1  ;;  %v1319_v48 = vmul.f32 %v2985_v0, %v3093_v15  ;;  %v454_v26 = vunpack.c.l.bf16 %v446_v19 }
  0xbb   : > { %v1067_v60 = vadd.f32 %v1031_v61, %v927_v22  ;;  %v1239_v41 = vrot.slane %v3109_v58, 1  ;;  %v1318_v23 = vmul.f32 %v2985_v0, %v1294_v56  ;;  %v421_v2 = vmul.f32 %v2857_v54, %v2425_v27 }
  0xbc   : > { %v2202_v63 = vpop.eup %2201  ;;  %v3117_v24 = vadd.f32 %v3048_v50, %v1438_v11  ;;  %v1379_v45 = vrot.slane %v1319_v48, 2  ;;  %v480_v49 = vmul.f32 %v2427_v28, %v454_v26  ;;  %v621_v16 = vmul.f32 %v2429_v29, %v454_v26 }
  0xbd   : > { %v1508_v35 = vmul.f32 0.5, %v2202_v63  ;;  %v1136_v25 = vadd.f32 %v1120_v62, %v1067_v60  ;;  %v1240_v40 = vsel %vm508_vm1, %v1238_v1, %v1239_v41  ;;  %v1378_v38 = vrot.slane %v1318_v23, 2  ;;  %v588_v60 = vld [vmem:[%s2403_s16 + $0x54] sm:$0xe] }
  0xbe   : > { %v1477_v37 = vmul.f32 0.5, %v3117_v24  ;;  %v805_v39 = vunpack.c.l.bf16 %v1978_v46  ;;  %v542_v12 = vrot.slane %v480_v49, 1  ;;  %v683_v4 = vrot.slane %v621_v16, 2  ;;  %v1987_v16 = vld [vmem:[%s2403_s16 + $0x60] sm:$0xe] }
  0xbf   : > { %v1524_v6 = vadd.f32 0.5, %v1508_v35  ;;  %v1276_v44 = vadd.f32 %v1240_v40, %v1136_v25  ;;  %v1380_v20 = vsel %vm649_vm2, %v1378_v38, %v1379_v45  ;;  %v772_v22 = vmul.f32 %v2431_v30, %v3069_v36 }
  0xc0   : > { %2203 = vtanh.f32 %v1477_v37  ;;  %v831_v47 = vmul.f32 %v2433_v31, %v805_v39  ;;  %v971_v17 = vmul.f32 %v2435_v32, %v805_v39  ;;  %v543_v54 = vsel %vm508_vm1, %v540_v9, %v542_v12 }
  0xc1   : > { %v3131_v10 = vmul.f32 %v1524_v6, %v3051_v21  ;;  %v1416_v53 = vadd.f32 %v1380_v20, %v1276_v44  ;;  %v684_v43 = vsel %vm649_vm2, %v681_v7, %v683_v4  ;;  %v1154_v61 = vunpack.c.l.bf16 %v2010_v57  ;;  %v2002_v4 = vld [vmem:[%s2403_s16 + $0x6c] sm:$0xff]  }
  0xc2   : > { %v578_v62 = vadd.f32 %v543_v54, %v421_v2  ;;  %v892_v58 = vrot.slane %v831_v47, 1  ;;  %v402_v19 = vunpack.c.l.bf16 %v386_v51  ;;  %v1032_v11 = vrot.slane %v971_v17, 2 }
  0xc3   : > { %1598 = vxpose.xlu0.b32.cont [11/16] (narrow) %v3131_v10, 16  ;;  %v1439_v21 = vmul.f32 %v3029_v18, %v1416_v53  ;;  %v1121_v59 = vmul.f32 %v3093_v15, %v2437_v33  ;;  %v1180_v9 = vmul.f32 %v2439_v34, %v1154_v61  ;;  %v1320_v5 = vmul.f32 %v2985_v0, %v1154_v61 }
  0xc4   : > { %v719_v36 = vadd.f32 %v684_v43, %v578_v62  ;;  %v893_v1 = vsel %vm508_vm1, %v890_v14, %v892_v58  ;;  %v3155_v56 = vunpack.c.h.bf16 %v386_v51  ;;  %v1033_v48 = vsel %vm649_vm2, %v1030_v52, %v1032_v11 }
  0xc5   : > { %v3150_v7 = vadd.f32 %v3048_v50, %v1439_v21  ;;  %v1241_v63 = vrot.slane %v1180_v9, 1  ;;  %v1381_v23 = vrot.slane %v1320_v5, 2  ;;  %v422_v26 = vmul.f32 %v2425_v27, %v402_v19  ;;  %v2019_v9 = vld [vmem:[%s2403_s16 + $0x6c] sm:$0xe] }
  0xc6   : > { %v788_v35 = vadd.f32 %v772_v22, %v719_v36  ;;  %v481_v25 = vmul.f32 %v2427_v28, %v402_v19  ;;  %v3166_v3 = vmul.f32 %v2427_v28, %v3155_v56  ;;  %v596_v40 = vunpack.c.l.bf16 %v588_v60 }
  0xc7   : > { %v1478_v46 = vmul.f32 0.5, %v3150_v7  ;;  %v1242_v14 = vsel %vm508_vm1, %v1239_v41, %v1241_v63  ;;  %v1382_v8 = vsel %vm649_vm2, %v1379_v45, %v1381_v23  ;;  %v3172_v52 = vmul.f32 %v2429_v29, %v3155_v56  ;;  %v447_v23 = vld [vmem:[%s2403_s16 + $0x5c] sm:$0x1] }
  0xc8   : > { %v928_v37 = vadd.f32 %v893_v1, %v788_v35  ;;  %v544_v38 = vrot.slane %v481_v25, 1  ;;  %v545_v49 = vrot.slane %v3166_v3, 1  ;;  %v622_v44 = vmul.f32 %v2429_v29, %v596_v40 }
  0xc9   : > { %2205 = vtanh.f32 %v1478_v46  ;;  %v686_v2 = vrot.slane %v3172_v52, 2  ;;  %v773_v41 = vmul.f32 %v3088_v55, %v2431_v30  ;;  %v832_v45 = vmul.f32 %v3088_v55, %v2433_v31 }
  0xca   : > { %v2204_v6 = vpop.eup %2203  ;;  %v1068_v57 = vadd.f32 %v1033_v48, %v928_v37  ;;  %v546_v20 = vsel %vm508_vm1, %v544_v38, %v545_v49  ;;  %v3187_v12 = vmul.f32 %v3093_v15, %v2433_v31  ;;  %v685_v53 = vrot.slane %v622_v44, 2 }
  0xcb   : > { %v1509_v39 = vmul.f32 0.5, %v2204_v6  ;;  %v579_v51 = vadd.f32 %v546_v20, %v422_v26  ;;  %v894_v47 = vrot.slane %v832_v45, 1  ;;  %v946_v17 = vunpack.c.l.bf16 %v1987_v16 }
  0xcc   : > { %v1137_v43 = vadd.f32 %v1121_v59, %v1068_v57  ;;  %v895_v55 = vrot.slane %v3187_v12, 1  ;;  %v3193_v22 = vmul.f32 %v3093_v15, %v2435_v32  ;;  %v687_v61 = vsel %vm649_vm2, %v685_v53, %v686_v2 }
  0xcd   : > { %v1525_v54 = vadd.f32 0.5, %v1509_v39  ;;  %v972_v21 = vmul.f32 %v2435_v32, %v946_v17  ;;  %v1102_v62 = vunpack.c.l.bf16 %v2002_v4  ;;  %v3199_v58 = vunpack.c.h.bf16 %v2002_v4 }
  0xce   : > { %v1277_v11 = vadd.f32 %v1242_v14, %v1137_v43  ;;  %v720_v59 = vadd.f32 %v687_v61, %v579_v51  ;;  %v896_v5 = vsel %vm508_vm1, %v894_v47, %v895_v55  ;;  %v1035_v1 = vrot.slane %v3193_v22, 2 }
  0xcf   : > { %v3202_v19 = vmul.f32 %v1525_v54, %v3117_v24  ;;  %v1034_v36 = vrot.slane %v972_v21, 2  ;;  %v1181_v60 = vmul.f32 %v2439_v34, %v1102_v62  ;;  %v3213_v24 = vmul.f32 %v2439_v34, %v3199_v58 }
  0xd0   : > { %v1417_v48 = vadd.f32 %v1382_v8, %v1277_v11  ;;  %v789_v63 = vadd.f32 %v773_v41, %v720_v59  ;;  %v1122_v46 = vmul.f32 %v2437_v33, %v1102_v62  ;;  %v1295_v25 = vunpack.c.l.bf16 %v2019_v9  ;;  %v1979_v41 = vld [vmem:[%s2403_s16 + $0x68] sm:$0x1] }
  0xd1   : > { %1599 = vxpose.xlu0.b32.cont [12/16] (narrow) %v3202_v19, 16  ;;  %v1036_v26 = vsel %vm649_vm2, %v1034_v36, %v1035_v1  ;;  %v1243_v35 = vrot.slane %v1181_v60, 1  ;;  %v1244_v38 = vrot.slane %v3213_v24, 1  ;;  %v1322_v8 = vmul.f32 %v2985_v0, %v3199_v58 }
  0xd2   : > { %v1440_v40 = vmul.f32 %v3029_v18, %v1417_v48  ;;  %v929_v37 = vadd.f32 %v896_v5, %v789_v63  ;;  %v1321_v6 = vmul.f32 %v2985_v0, %v1295_v25  ;;  %v455_v44 = vunpack.c.l.bf16 %v447_v23  ;;  %v2011_v5 = vld [vmem:[%s2403_s16 + $0x74] sm:$0x1] }
  0xd3   : > { %v2206_v14 = vpop.eup %2205  ;;  %v1245_v57 = vsel %vm508_vm1, %v1243_v35, %v1244_v38  ;;  %v1384_v20 = vrot.slane %v1322_v8, 2  ;;  %v423_v43 = vmul.f32 %v2425_v27, %v3155_v56  ;;  %v806_v22 = vunpack.c.l.bf16 %v1979_v41 }
  0xd4   : > { %v1510_v16 = vmul.f32 0.5, %v2206_v14  ;;  %v1463_v45 = vadd.f32 %v3048_v50, %v1440_v40  ;;  %v1069_v39 = vadd.f32 %v1036_v26, %v929_v37  ;;  %v1383_v51 = vrot.slane %v1321_v6, 2 }
  0xd5   : > { %v483_v53 = vmul.f32 %v2427_v28, %v455_v44  ;;  %v624_v47 = vmul.f32 %v2429_v29, %v455_v44  ;;  %v834_v9 = vmul.f32 %v2433_v31, %v806_v22  ;;  %v974_v28 = vmul.f32 %v2435_v32, %v806_v22 }
  0xd6   : > { %v1526_v4 = vadd.f32 0.5, %v1510_v16  ;;  %v1479_v17 = vmul.f32 0.5, %v1463_v45  ;;  %v1138_v54 = vadd.f32 %v1122_v46, %v1069_v39  ;;  %v1385_v21 = vsel %vm649_vm2, %v1383_v51, %v1384_v20 }
  0xd7   : > { %v547_v62 = vrot.slane %v483_v53, 1  ;;  %v688_v11 = vrot.slane %v624_v47, 2  ;;  %v774_v36 = vmul.f32 %v3093_v15, %v2431_v30  ;;  %v897_v60 = vrot.slane %v834_v9, 1  ;;  %v1546_v9 = vld [vmem:[#allocation2] sm:$0x1] }
  0xd8   : > { %v1542_v61 = vmul.f32 %v1526_v4, %v3150_v7  ;;  %2207 = vtanh.f32 %v1479_v17  ;;  %v1278_v59 = vadd.f32 %v1245_v57, %v1138_v54  ;;  %v1037_v48 = vrot.slane %v974_v28, 2 }
  0xd9   : > { %v548_v29 = vsel %vm508_vm1, %v545_v49, %v547_v62  ;;  %v689_v27 = vsel %vm649_vm2, %v686_v2, %v688_v11  ;;  %v1155_v31 = vunpack.c.l.bf16 %v2011_v5  ;;  %v898_v3 = vsel %vm508_vm1, %v895_v55, %v897_v60 }
  0xda   : > { %1600 = vxpose.xlu0.b32.cont [13/16] (narrow) %v1542_v61, 16  ;;  %v1418_v7 = vadd.f32 %v1385_v21, %v1278_v59  ;;  %v580_v56 = vadd.f32 %v548_v29, %v423_v43  ;;  %v1038_v23 = vsel %vm649_vm2, %v1035_v1, %v1037_v48  ;;  %v1123_v46 = vmul.f32 %v2437_v33, %v3199_v58 }
  0xdb   : > { %v1183_v49 = vmul.f32 %v2439_v34, %v1155_v31  ;;  %v1323_v52 = vmul.f32 %v2985_v0, %v1155_v31  ;;  %v1565_v1 = vsel %vm1547_vm3, %v3091_v13, 0.0  ;;  %v1567_v6 = vsel %vm1547_vm3, %v3131_v10, 0.0 }
  0xdc   : > { %v1441_v32 = vmul.f32 %v3029_v18, %v1418_v7  ;;  %v721_v63 = vadd.f32 %v689_v27, %v580_v56  ;;  %v1566_v33 = vadd.f32 %v1565_v1, %v3019_v42  ;;  %v1571_v42 = vsel %vm1547_vm3, %v1542_v61, 0.0  ;;  %v1636_v56 = vld [vmem:[%s3327_s4] sm:$0xff] (!%p2025_p12) }
  0xdd   : > { %v1246_v30 = vrot.slane %v1183_v49, 1  ;;  %v1386_v35 = vrot.slane %v1323_v52, 2  ;;  %v2277_v60 = vmov (!%p2025_p12), 0.0|0.0   ;;  %vm2278_vm5 = vmmov (!%p2025_p12), 0   ;;  %v1638_v49 = vld [vmem:[%s3328_s5] sm:$0x1] (!%p2025_p12) }
  0xde   : > { %v1464_v2 = vadd.f32 %v3048_v50, %v1441_v32  ;;  %v790_v24 = vadd.f32 %v774_v36, %v721_v63  ;;  %v1568_v39 = vadd.f32 %v1567_v6, %v1566_v33  ;;  %v1637_v36 = vld [vmem:[%s3327_s4 + $0x8] sm:$0xff] (!%p2025_p12)  ;;  %2117 = vmatprep.subr.bf16.mxu0 (!%p2025_p12), %v2277_v60  ;;  %v2279_v31 = vmov (!%p2025_p12), 0.0  }
  0xdf   : > { %v1247_v34 = vsel %vm508_vm1, %v1244_v38, %v1246_v30  ;;  %v1387_v40 = vsel %vm649_vm2, %v1384_v20, %v1386_v35  ;;  %v1569_v20 = vsel %vm1547_vm3, %v3202_v19, 0.0  ;;  %v2118_v48 = vpack.c.bf16 (!%p2025_p12), %v1637_v36, %v1636_v56  ;;  %2109 = vmatprep.mubr.msk.f32.mxu0 (!%p2025_p12), %vm2278_vm5, %v2279_v31  ;;  %2112 = vmatprep.subr.mxu1 (!%p2025_p12), %v2279_v31  ;;  %v1718_v35 = vld [vmem:[%s3330_s7] sm:$0x1] (!%p2025_p12) }
  0xe0   : > { %v1480_v15 = vmul.f32 0.5, %v1464_v2  ;;  %v930_v26 = vadd.f32 %v898_v3, %v790_v24  ;;  %v1570_v4 = vadd.f32 %v1569_v20, %v1568_v39  ;;  %2114 = vmatprep.mubr.msk.f32.mxu1 (!%p2025_p12), %vm2278_vm5, %v2279_v31  ;;  %v1717_v3 = vld [vmem:[%s3329_s6] sm:$0xf] (!%p2025_p12)  ;;  %vm1723_vm6 = vcmask (!%p2025_p12), 1043456  }
  0xe1   : > { %2119 = vmatpush3.bf16.msra.mxu0 (!%p2025_p12), %v2118_v48  ;;  %2113 = vmatpush3.msk.msra.mxu1 (!%p2025_p12), %vm1723_vm6, %v1717_v3  ;;  %vm1719_vm7 = vcmask (!%p2025_p12), 31744  }
  0xe2   : > { %v2208_v25 = vpop.eup %2207  ;;  %2209 = vtanh.f32 %v1480_v15  ;;  %v1070_v12 = vadd.f32 %v1038_v23, %v930_v26 }
  0xe3   : > { %v1511_v55 = vmul.f32 0.5, %v2208_v25 }
  0xe4   : > { %v1139_v14 = vadd.f32 %v1123_v46, %v1070_v12 }
  0xe5   : > { %v1527_v0 = vadd.f32 0.5, %v1511_v55 }
  0xe6   : > { %v1279_v37 = vadd.f32 %v1247_v34, %v1139_v14 }
  0xe7   : > { %v1543_v8 = vmul.f32 %v1527_v0, %v1463_v45 }
  0xe8   : > { %v1419_v16 = vadd.f32 %v1387_v40, %v1279_v37 }
  0xe9   : > { %1601 = vxpose.xlu0.b32.cont [14/16] (narrow) %v1543_v8, 16  ;;  %v1573_v51 = vsel %vm1547_vm3, %v1543_v8, 0.0 }
  0xea   : > { %v1442_v58 = vmul.f32 %v3029_v18, %v1419_v16  ;;  %v1572_v18 = vadd.f32 %v1571_v42, %v1570_v4 }
  0xec   : > { %v2210_v44 = vpop.eup %2209  ;;  %v1465_v38 = vadd.f32 %v3048_v50, %v1442_v58  ;;  %v1574_v53 = vadd.f32 %v1573_v51, %v1572_v18 }
  0xed   : > { %v1512_v41 = vmul.f32 0.5, %v2210_v44 }
  0xee   : > { %v1481_v57 = vmul.f32 0.5, %v1465_v38 }
  0xef   : > { %v1528_v13 = vadd.f32 0.5, %v1512_v41 }
  0xf0   : > { %2211 = vtanh.f32 %v1481_v57 }
  0xf1   : > { %v1544_v45 = vmul.f32 %v1528_v13, %v1464_v2 }
  0xf3   : > { %1602 = vxpose.xlu0.b32.cont [15/16] (narrow) %v1544_v45, 16  ;;  %v1575_v50 = vsel %vm1547_vm3, %v1544_v45, 0.0 }
  0xf4   : > { %v1576_v54 = vadd.f32 %v1575_v50, %v1574_v53 }
  0xfa   : > { %v2212_v10 = vpop.eup %2211 }
  0xfb   : > { %v1513_v47 = vmul.f32 0.5, %v2212_v10 }
  0xfd   : > { %v1529_v17 = vadd.f32 0.5, %v1513_v47 }
  0xff   : > { %v1545_v43 = vmul.f32 %v1529_v17, %v1465_v38 }
 0x101   : > { %v1577_v19 = vsel %vm1547_vm3, %v1545_v43, 0.0  ;;  %1603 = vxpose.xlu0.b32.end [16/16] (narrow) %v1545_v43, 16 }
 0x102   : > { %v1578_v22 = vadd.f32 %v1577_v19, %v1576_v54 }
 0x104   : > { %v1579_v21 = vrot.slane %v1578_v22, 4 }
 0x106   : > { %v1580_v62 = vadd.f32 %v1579_v21, %v1578_v22 }
 0x108   : > { %v1581_v61 = vrot.slane %v1580_v62, 2 }
 0x10a   : > { %v1582_v11 = vadd.f32 %v1581_v61, %v1580_v62 }
 0x10c   : > { %v1583_v59 = vrot.slane %v1582_v11, 1 }
 0x10e   : > { %v1584_v28 = vadd.f32 %v1583_v59, %v1582_v11 }
 0x110   : > { %v1585_v5 = vadd.f32 %v1584_v28, %v1546_v9 }
 0x112   : > { %1587 = vst.msk [vmem:[#allocation2] sm:$0x1] %vm1586_vm4, %v1585_v5 }
 0x119   : > { %v1634_v32 = vld [vmem:[#allocation2] sm:$0x1] (!%p2025_p12) }
 0x11a   : > { %v1635_v63 = vmul.f32 (!%p2025_p12), 0.00390625, %v1634_v32 }
 0x11c   : > { %2110 = vmatmul.mubr.msk.f32.vlgmr.msra.gmra.mrb[0].mxu0 (!%p2025_p12), %vm1547_vm3, %v1635_v63 }
 0x145   : > { %v1604_v29 = vpop.trf.xlu0 }
 0x146   : > { %1633 = sbr.rel (%p2025_p12) target bundleno = 749 (0x2ed), region = 60 }
 0x149   : > { %v1605_v27 = vpop.trf.xlu0 }
 0x14a   : > { %v2087_v7 = vpack.c.bf16 %v1605_v27, %v1604_v29 }
 0x14c   : > { %2088 = vst [vmem:[%s2405_s30] sm:$0xff] %v2087_v7  }
 0x1ef   : > { %v1708_v52 = vpop.f32.mrb[0].mxu0 }
 0x1f0   : > { %v1709_v2 = vadd.f32 %v1708_v52, %v1638_v49  ;;  %v2111_v24 = vpop.f32.mrb[1].mxu0 }
 0x1f2   : > { %v1712_v23 = vmul.f32 0.5, %v1709_v2 }
 0x1f4   : > { %2216 = vtanh.f32 %v1712_v23 }
 0x1fe   : > { %v2217_v30 = vpop.eup %2216 }
 0x1ff   : > { %v1714_v15 = vmul.f32 0.5, %v2217_v30 }
 0x201   : > { %v1715_v26 = vadd.f32 0.5, %v1714_v15 }
 0x203   : > { %v1716_v46 = vmul.f32 %v1715_v26, %v1709_v2 }
 0x205   : > { %2115 = vmatmul.mubr.msk.f32.vlgmr.msra.gmra.mrb[0].mxu1 %vm1719_vm7, %v1716_v46 }
 0x2d8   : > { %v1793_v25 = vpop.f32.mrb[0].mxu1 }
 0x2d9   : > { %v1794_v12 = vadd.f32 %v1793_v25, %v1718_v35  ;;  %v2116_v55 = vpop.f32.mrb[1].mxu1 }
 0x2db   : > { %v1797_v34 = vmul.f32 0.5, %v1794_v12 }
 0x2dd   : > { %2218 = vtanh.f32 %v1797_v34 }
 0x2e7   : > { %v2219_v14 = vpop.eup %2218 }
 0x2e8   : > { %v1799_v0 = vmul.f32 0.5, %v2219_v14 }
 0x2ea   : > { %v1800_v40 = vadd.f32 0.5, %v1799_v0 }
 0x2ec   : > { %1801 = vst.msk [vmem:[%s363_s22] sm:$0x1] %vm1586_vm4, %v1800_v40 }
 0x2ed PF: > { %1811 = sbr.rel (!%p2376_p5) target bundleno = 757 (0x2f5), region = 64  ;;  %s2030_s19 = sshll.u32 (%p2376_p5), %s2262_s12, 2 }
 0x2ee   : > { %s1813_s21 = sadd.s32 (%p2376_p5), %s2258_s11, %s2030_s19 }
 0x2ef   : > { %s2031_s23 = sshll.u32 (%p2376_p5), %s1813_s21, 2 }
 0x2f0   : > { %s1815_s26 = scalar_lea.vmem (%p2376_p5), %s3331_s8, %s2031_s23 }
 0x2f3   : > { %v1831_v37 = vld [vmem:[%s2405_s30] sm:$0xf] (%p2376_p5)  ;;  %v1833_v1 = vld [vmem:[%s2405_s30 + $0x4] sm:$0xf] (%p2376_p5) }
 0x2f4   : > { %1832 = vst [vmem:[%s1815_s26] sm:$0xf] %v1831_v37  ;;  %1834 = vst [vmem:[%s1815_s26 + $0x8] sm:$0xf] %v1833_v1 }
 0x2f5 PF: > { %s20_s15 = sadd.s32 1, %s2274_s15   ;;  %s3338_s20 = sld [smem:[#allocation4_spill]] }
 0x2f6   : > { %p17_p13 = scmp.ge.s32.totalorder %s20_s15, 6   ;;  %s3339_s29 = sld [smem:[#allocation5_spill]] }
 0x2f7   : > { %s3340_s30 = smov %s2254_s10  ;;  %s3341_s10 = smov %s2387_s24 }
 0x2f8   : > { %s3342_s11 = smov %s2266_s13  ;;  %s3343_s12 = smov %s2270_s14 }
 0x2f9   :  { %19 = sbr.rel (!%p17_p13) target bundleno = 4 (0x4), region = 145 }
 0x2fb   : > { %s3344_s13 = smov %s3338_s20 }
 0x2fc   : > { %s3345_s14 = smov %s3339_s29 }

</bundles_post_ra>
